<compile_context>
chip_gen: v7x
topology: tpu7x:2x2x1
jax: 0.10.0
libtpu: 0.0.40
codegen_flags: <defaults>
</compile_context>

<pallas_src>
import functools

import jax
import jax.numpy as jnp
from jax import lax
from jax.experimental import pallas as pl
from jax.experimental.pallas import tpu as pltpu


# ---------------------------------------------------------------------------
# Pallas kernel: inverse-warp one source view into the reference frame.
# Grid: (batch, source_view, output_pixel_tile).
# ---------------------------------------------------------------------------
def _inverse_warp_kernel(params_ref, gx_ref, gy_ref, depth_ref, view_ref,
                         warped_ref, mask_ref, *, h, w, c, nv):
    f32 = jnp.float32
    bf16 = jnp.bfloat16

    b = pl.program_id(0)   # batch        ("parallel")
    v = pl.program_id(1)   # source view  ("parallel")
    base = (b * nv + v) * 16          # flat 1-D SMEM param layout

    gx = gx_ref[...]       # (1, TN) exact ref-pixel x coordinate
    gy = gy_ref[...]       # (1, TN) exact ref-pixel y coordinate
    d = depth_ref[...]     # (1, TN) reference depth

    # Fused projection: source_pix_hom = (A @ [gx, gy, 1]) * depth + t
    A00 = params_ref[base + 0]; A01 = params_ref[base + 1]; A02 = params_ref[base + 2]
    A10 = params_ref[base + 3]; A11 = params_ref[base + 4]; A12 = params_ref[base + 5]
    A20 = params_ref[base + 6]; A21 = params_ref[base + 7]; A22 = params_ref[base + 8]
    t0 = params_ref[base + 9]; t1 = params_ref[base + 10]; t2 = params_ref[base + 11]

    xp = (A00 * gx + A01 * gy + A02) * d + t0
    yp = (A10 * gx + A11 * gy + A12) * d + t1
    zp = (A20 * gx + A21 * gy + A22) * d + t2
    rz = 1.0 / (zp + 1e-10)          # one divide shared by both coordinates
    x = xp * rz                      # absolute source-pixel x
    y = yp * rz
    # The reference's normalize -> denormalize round trip cancels exactly.

    x0 = jnp.floor(x).astype(jnp.int32)
    x1 = x0 + 1
    y0 = jnp.floor(y).astype(jnp.int32)
    y1 = y0 + 1
    # Reproduces the reference validity quirk (y0 checked twice, y1 never).
    mask = ((x0 >= 0) & (x1 <= w - 1) & (y0 >= 0) & (y0 <= h - 1)).astype(f32)
    x0c = jnp.clip(x0, 0, w - 1)
    x1c = jnp.clip(x1, 0, w - 1)
    y0c = jnp.clip(y0, 0, h - 1)
    y1c = jnp.clip(y1, 0, h - 1)

    # Separable bilinear weights (identical to wa..wd of the reference once
    # expanded: wa = wx0*wy0 at (y0c,x0c), wb = wx0*wy1, wc = wx1*wy0, wd = wx1*wy1;
    # coincident clamped taps sum, exactly as in the torch gather-and-add).
    wx0 = x1c.astype(f32) - x
    wx1 = 1.0 - wx0
    wy0 = y1c.astype(f32) - y
    wy1 = 1.0 - wy0

    # One-hot column-weight matrix Wx[x, p]; built in f32 (v5e-friendly) and
    # cast to bf16 once, right before the MXU.  (w,1) iota broadcasts against
    # the (1,TN) indices -- no materialized (w,TN) int32 iota.
    xi = lax.broadcasted_iota(jnp.int32, (w, 1), 0)
    Wx = (jnp.where(xi == x0c, wx0, 0.0)
          + jnp.where(xi == x1c, wx1, 0.0)).astype(bf16)      # (w, TN)

    # Row-weight matrix Wy[y, p], kept f32 for the VPU combine.
    yi = lax.broadcasted_iota(jnp.int32, (h, 1), 0)
    Wy = jnp.where(yi == y0c, wy0, 0.0) + jnp.where(yi == y1c, wy1, 0.0)  # (h, TN)

    # Stage 1: x-interpolation of every source row on the MXU.
    #   view_ref is (C*h, w); tmp[(c,y), p] = sum_x img_c[y,x] * Wx[x,p]
    tmp = jnp.dot(view_ref[...], Wx, preferred_element_type=f32)   # (C*h, TN) f32

    # Stage 2: per-pixel y-combine (h is a multiple of 8, so the static
    # per-channel slices are sublane-tile aligned).
    for ci in range(c):
        row = jnp.sum(tmp[ci * h:(ci + 1) * h, :] * Wy, axis=0, keepdims=True)
        warped_ref[pl.ds(ci, 1), :] = row                      # lane-dense store
    mask_ref[...] = mask


def _pick_tn(hw):
    """Largest output-pixel tile <= 2048 that divides HW (multiple of 128)."""
    for tn in (2048, 1024, 512, 256, 128):
        if hw % tn == 0:
            return tn
    # TODO(synk): pad HW to a multiple of 128 instead of falling back to one tile.
    return hw


# ---------------------------------------------------------------------------
# Glue: bilinear downsample (F.interpolate equivalent) and camera algebra.
# ---------------------------------------------------------------------------
def _interp_bilinear_nchw(x, out_h, out_w):
    """F.interpolate(mode='bilinear', align_corners=False) equivalent."""
    _, _, h, w = x.shape

    def src_idx(out_size, in_size):
        scale = in_size / out_size
        s = (jnp.arange(out_size, dtype=jnp.float32) + 0.5) * scale - 0.5
        s = jnp.maximum(s, 0.0)
        i0 = jnp.minimum(jnp.floor(s).astype(jnp.int32), in_size - 1)
        i1 = jnp.minimum(i0 + 1, in_size - 1)
        lam = s - i0.astype(jnp.float32)
        return i0, i1, lam

    y0, y1, ly = src_idx(out_h, h)
    x0, x1, lx = src_idx(out_w, w)
    a = x[:, :, y0, :][:, :, :, x0]
    b = x[:, :, y0, :][:, :, :, x1]
    c = x[:, :, y1, :][:, :, :, x0]
    d = x[:, :, y1, :][:, :, :, x1]
    lx_ = lx[None, None, None, :]
    ly_ = ly[None, None, :, None]
    top = a * (1.0 - lx_) + b * lx_
    bot = c * (1.0 - lx_) + d * lx_
    return top * (1.0 - ly_) + bot * ly_


def _view_params(ref_cam, view_cam):
    """Fused projection (A | t) such that source_pix_hom = (A@[x,y,1])*depth + t."""
    R_l = ref_cam[:, 0, 0:3, 0:3]
    t_l = ref_cam[:, 0, 0:3, 3:4]
    K_l = ref_cam[:, 1, 0:3, 0:3]
    R_r = view_cam[:, 0, 0:3, 0:3]
    t_r = view_cam[:, 0, 0:3, 3:4]
    B = R_l.shape[0]

    K_inv = jnp.linalg.inv(K_l)
    R_rel = R_r @ jnp.swapaxes(R_l, 1, 2)
    t_rel = t_r - R_rel @ t_l
    A = (K_l @ R_rel) @ K_inv                 # == proj[:3, :3] @ K_left_inv
    t = (K_l @ t_rel)[:, :, 0]                # == proj[:3, 3]
    return jnp.concatenate(
        [A.reshape(B, 9), t, jnp.zeros((B, 4), jnp.float32)], axis=1)   # (B, 16)


# ---------------------------------------------------------------------------
# UnSupLoss.forward
# ---------------------------------------------------------------------------
def unsup_loss(imgs, cams, depth, smooth_lambda=1.0):
    """imgs: [B,V,C,H,W], cams: [B,V,2,4,4], depth: [B,H//4,W//4] -> scalar loss."""
    f32 = jnp.float32
    B, V, C, H, W = imgs.shape
    assert V - 1 >= 3, "top-k(k=3) over source views requires >= 4 views"
    h, w = int(H * 0.25), int(W * 0.25)
    assert depth.shape == (B, h, w)
    assert h % 8 == 0, "quarter-res height must be a multiple of 8"
    hw = h * w

    # F.interpolate(scale_factor=0.25, mode='bilinear'); everything stays NCHW.
    small = _interp_bilinear_nchw(
        imgs.astype(f32).reshape(B * V, C, H, W), h, w).reshape(B, V, C, h, w)
    ref_img = small[:, 0]                                 # [B, C, h, w]

    ref_cam = cams[:, 0].astype(f32)
    params = jnp.stack([_view_params(ref_cam, cams[:, vi].astype(f32))
                        for vi in range(1, V)], axis=1)   # (B, V-1, 16)
    params_flat = params.reshape(-1)                      # 1-D SMEM layout

    # Kernel inputs: exact pixel grid, per-batch depth row, source views laid
    # out as (C*h, w) bf16 so stage-1 needs no in-kernel transpose.
    gx = jnp.tile(jnp.arange(w, dtype=f32), (h,)).reshape(1, hw)
    gy = jnp.repeat(jnp.arange(h, dtype=f32), w).reshape(1, hw)
    depth_row = depth.astype(f32).reshape(B, 1, hw)
    view_flat = small[:, 1:].reshape(B, V - 1, C * h, w).astype(jnp.bfloat16)

    tn = _pick_tn(hw)
    n_tiles = hw // tn
    nv = V - 1

    # Advisory cost estimate so XLA overlaps the interpolate/SSIM glue.
    n_prog = B * nv * n_tiles
    est_flops = n_prog * (2 * (C * h) * w * tn + 2 * C * h * tn + 64 * tn)
    est_bytes = (n_prog * ((C * h * w) * 2 + 3 * tn * 4 + (C + 1) * tn * 4)
                 + B * nv * 16 * 4)
    cost = pl.CostEstimate(flops=est_flops, transcendentals=0,
                           bytes_accessed=est_bytes)

    kernel = functools.partial(_inverse_warp_kernel, h=h, w=w, c=C, nv=nv)
    warped_chw, mask_row = pl.pallas_call(
        kernel,
        out_shape=(
            jax.ShapeDtypeStruct((B, nv, C, hw), f32),
            jax.ShapeDtypeStruct((B, nv, 1, hw), f32),
        ),
        grid_spec=pltpu.PrefetchScalarGridSpec(
            num_scalar_prefetch=0,
            grid=(B, nv, n_tiles),                    # (batch, view, pixel-tile)
            in_specs=[
                pl.BlockSpec(memory_space=pltpu.MemorySpace.SMEM),          # params
                pl.BlockSpec((1, tn), lambda b, v, n: (0, n)),              # gx
                pl.BlockSpec((1, tn), lambda b, v, n: (0, n)),              # gy
                pl.BlockSpec((None, 1, tn), lambda b, v, n: (b, 0, n)),     # depth
                pl.BlockSpec((None, None, C * h, w),
                             lambda b, v, n: (b, v, 0, 0)),                 # view
            ],
            out_specs=[
                pl.BlockSpec((None, None, C, tn), lambda b, v, n: (b, v, 0, n)),
                pl.BlockSpec((None, None, 1, tn), lambda b, v, n: (b, v, 0, n)),
            ],
        ),
        compiler_params=pltpu.CompilerParams(
            dimension_semantics=("parallel", "parallel", "arbitrary"),
            vmem_limit_bytes=48 * 1024 * 1024),
        cost_estimate=cost,
    )(params_flat, gx, gy, depth_row, view_flat)

    warped = warped_chw.reshape(B, nv, C, h, w)           # NCHW, no transpose
    mask = mask_row.reshape(B, nv, 1, h, w)

    # ---------------- losses (small standard ops, NCHW JAX glue) ------------
    def smooth_l1(a, b_):
        diff = a - b_
        ad = jnp.abs(diff)
        return jnp.mean(jnp.where(ad < 1.0, 0.5 * diff * diff, ad - 0.5))

    def grad_dx_dy(p):                       # torch `gradient` (dx=width, dy=height)
        return (p[:, :, :, 1:] - p[:, :, :, :-1],
                p[:, :, 1:, :] - p[:, :, :-1, :])

    def reconstr(warp_v, mask_v):            # compute_reconstr_loss(simple=False)
        wm = warp_v * mask_v
        rm = ref_img * mask_v
        w_dx, w_dy = grad_dx_dy(wm)
        r_dx, r_dy = grad_dx_dy(rm)
        photo = smooth_l1(wm, rm)
        grad = smooth_l1(w_dx, r_dx) + smooth_l1(w_dy, r_dy)
        return 0.5 * photo + 0.5 * grad

    def pool3(x_nchw):
        return lax.reduce_window(x_nchw, 0.0, lax.add,
                                 (1, 1, 3, 3), (1, 1, 1, 1), 'VALID') / 9.0

    def ssim(x_nchw, y_nchw, m_nchw):        # reference permutes to NCHW anyway
        c1, c2 = 0.01 ** 2, 0.03 ** 2
        mu_x = pool3(x_nchw)
        mu_y = pool3(y_nchw)
        sig_x = pool3(x_nchw * x_nchw) - mu_x * mu_x
        sig_y = pool3(y_nchw * y_nchw) - mu_y * mu_y
        sig_xy = pool3(x_nchw * y_nchw) - mu_x * mu_y
        ssim_n = (2 * mu_x * mu_y + c1) * (2 * sig_xy + c2)
        ssim_d = (mu_x * mu_x + mu_y * mu_y + c1) * (sig_x + sig_y + c2)
        return pool3(m_nchw) * jnp.clip((1.0 - ssim_n / ssim_d) / 2.0, 0.0, 1.0)

    reproj = []
    ssim_loss = jnp.float32(0.0)
    for vi in range(nv):                     # source view index = vi + 1
        wv = warped[:, vi]                   # (B, C, h, w)
        mv = mask[:, vi]                     # (B, 1, h, w)
        rl = reconstr(wv, mv)
        reproj.append(rl + 10000.0 * (1.0 - mv))            # (B, 1, h, w)
        if vi + 1 < 3:
            ssim_loss = ssim_loss + jnp.mean(ssim(ref_img, wv, mv))

    def depth_smoothness(d_nchw, img_nchw, lam):
        gxd = d_nchw[:, :, :, :-1] - d_nchw[:, :, :, 1:]
        gyd = d_nchw[:, :, :-1, :] - d_nchw[:, :, 1:, :]
        gxi = img_nchw[:, :, :, :-1] - img_nchw[:, :, :, 1:]
        gyi = img_nchw[:, :, :-1, :] - img_nchw[:, :, 1:, :]
        wx = jnp.exp(-(lam * jnp.mean(jnp.abs(gxi), axis=1, keepdims=True)))
        wy = jnp.exp(-(lam * jnp.mean(jnp.abs(gyi), axis=1, keepdims=True)))
        return jnp.mean(jnp.abs(gxd * wx)) + jnp.mean(jnp.abs(gyd * wy))

    # TODO(synk): args.smooth_lambda comes from a mocked config; default to 1.0.
    smooth_loss = depth_smoothness(depth.astype(f32)[:, None], ref_img,
                                   smooth_lambda)

    vol = jnp.stack(reproj, axis=-1)             # (B, 1, h, w, V-1)
    top_neg, _ = lax.top_k(-vol, 3)              # 3 smallest reprojection values
    top_vals = -top_neg
    top_vals = top_vals * (top_vals < 10000.0).astype(f32)
    reconstr_loss = jnp.mean(jnp.sum(top_vals, axis=-1))

    return 12.0 * reconstr_loss + 6.0 * ssim_loss + 0.18 * smooth_loss


if __name__ == "__main__":
    key = jax.random.PRNGKey(0)
    B, V, C = 2, 4, 3           # 1 reference + 3 source views (top-k needs >= 3)
    H, W = 64, 64               # full-res images; working resolution is H/4 x W/4
    h, w = H // 4, W // 4

    k1, k2 = jax.random.split(key)
    imgs = jax.random.uniform(k1, (B, V, C, H, W), dtype=jnp.float32)
    depth = 8.0 + 4.0 * jax.random.uniform(k2, (B, h, w), dtype=jnp.float32)

    # cams[b, v, 0] = extrinsic [R|t ; 0 0 0 1], cams[b, v, 1][:3,:3] = K
    f = 20.0
    Kmat = jnp.array([[f, 0.0, (w - 1) / 2.0],
                      [0.0, f, (h - 1) / 2.0],
                      [0.0, 0.0, 1.0]], jnp.float32)
    intr = jnp.zeros((4, 4), jnp.float32).at[0:3, 0:3].set(Kmat).at[3, 3].set(1.0)
    cams_list = []
    for bi in range(B):
        per_view = []
        for vi in range(V):
            t = jnp.array([0.23 * vi + 0.07 * bi, -0.17 * vi + 0.05 * bi, 0.0],
                          jnp.float32)
            ext = jnp.eye(4, dtype=jnp.float32).at[0:3, 3].set(t)
            per_view.append(jnp.stack([ext, intr], axis=0))
        cams_list.append(jnp.stack(per_view, axis=0))
    cams = jnp.stack(cams_list, axis=0)          # (B, V, 2, 4, 4)

    loss = jax.jit(unsup_loss)(imgs, cams, depth)
    jax.block_until_ready(loss)
    assert loss.shape == ()
    assert bool(jnp.isfinite(loss))
    print("KERNEL_OK")
</pallas_src>

<mosaic_0001>
module attributes {stable_mosaic.version = 11 : i64} {
  func.func @_inverse_warp_kernel(%arg0: i32, %arg1: i32, %arg2: i32, %arg3: memref<96xf32, #tpu.memory_space<smem>>, %arg4: memref<1x256xf32, #tpu.memory_space<vmem>>, %arg5: memref<1x256xf32, #tpu.memory_space<vmem>>, %arg6: memref<1x1x256xf32, #tpu.memory_space<vmem>>, %arg7: memref<1x1x48x16xbf16, #tpu.memory_space<vmem>>, %arg8: memref<1x1x3x256xf32, #tpu.memory_space<vmem>>, %arg9: memref<1x1x1x256xf32, #tpu.memory_space<vmem>>) attributes {dimension_semantics = [#tpu.dimension_semantics<parallel>, #tpu.dimension_semantics<parallel>, #tpu.dimension_semantics<arbitrary>], iteration_bounds = array<i64: 2, 3, 1>, scalar_prefetch = 0 : i64, scratch_operands = 0 : i64, tpu.core_type = #tpu.core_type<tc>, window_params = [{transform_indices = @transform_0, window_bounds = array<i64: 96>}, {transform_indices = @transform_1, window_bounds = array<i64: 1, 256>}, {transform_indices = @transform_2, window_bounds = array<i64: 1, 256>}, {transform_indices = @transform_3, window_bounds = array<i64: 1, 1, 256>}, {transform_indices = @transform_4, window_bounds = array<i64: 1, 1, 48, 16>}, {transform_indices = @transform_5, window_bounds = array<i64: 1, 1, 3, 256>}, {transform_indices = @transform_6, window_bounds = array<i64: 1, 1, 1, 256>}]} {
    %c3_i32 = arith.constant 3 : i32
    %0 = arith.muli %arg0, %c3_i32 : i32
    %1 = arith.addi %0, %arg1 : i32
    %c16_i32 = arith.constant 16 : i32
    %2 = arith.muli %1, %c16_i32 : i32
    %c0 = arith.constant 0 : index
    %c0_0 = arith.constant 0 : index
    %3 = vector.load %arg4[%c0, %c0_0] : memref<1x256xf32, #tpu.memory_space<vmem>>, vector<1x256xf32>
    %c0_1 = arith.constant 0 : index
    %c0_2 = arith.constant 0 : index
    %4 = vector.load %arg5[%c0_1, %c0_2] : memref<1x256xf32, #tpu.memory_space<vmem>>, vector<1x256xf32>
    %c0_3 = arith.constant 0 : index
    %c0_4 = arith.constant 0 : index
    %c0_5 = arith.constant 0 : index
    %5 = vector.load %arg6[%c0_3, %c0_4, %c0_5] : memref<1x1x256xf32, #tpu.memory_space<vmem>>, vector<1x1x256xf32>
    %6 = vector.shape_cast %5 : vector<1x1x256xf32> to vector<1x256xf32>
    %c0_i32 = arith.constant 0 : i32
    %7 = arith.addi %2, %c0_i32 : i32
    %8 = arith.index_cast %7 : i32 to index
    %9 = memref.load %arg3[%8] : memref<96xf32, #tpu.memory_space<smem>>
    %c1_i32 = arith.constant 1 : i32
    %10 = arith.addi %2, %c1_i32 : i32
    %11 = arith.index_cast %10 : i32 to index
    %12 = memref.load %arg3[%11] : memref<96xf32, #tpu.memory_space<smem>>
    %c2_i32 = arith.constant 2 : i32
    %13 = arith.addi %2, %c2_i32 : i32
    %14 = arith.index_cast %13 : i32 to index
    %15 = memref.load %arg3[%14] : memref<96xf32, #tpu.memory_space<smem>>
    %c3_i32_6 = arith.constant 3 : i32
    %16 = arith.addi %2, %c3_i32_6 : i32
    %17 = arith.index_cast %16 : i32 to index
    %18 = memref.load %arg3[%17] : memref<96xf32, #tpu.memory_space<smem>>
    %c4_i32 = arith.constant 4 : i32
    %19 = arith.addi %2, %c4_i32 : i32
    %20 = arith.index_cast %19 : i32 to index
    %21 = memref.load %arg3[%20] : memref<96xf32, #tpu.memory_space<smem>>
    %c5_i32 = arith.constant 5 : i32
    %22 = arith.addi %2, %c5_i32 : i32
    %23 = arith.index_cast %22 : i32 to index
    %24 = memref.load %arg3[%23] : memref<96xf32, #tpu.memory_space<smem>>
    %c6_i32 = arith.constant 6 : i32
    %25 = arith.addi %2, %c6_i32 : i32
    %26 = arith.index_cast %25 : i32 to index
    %27 = memref.load %arg3[%26] : memref<96xf32, #tpu.memory_space<smem>>
    %c7_i32 = arith.constant 7 : i32
    %28 = arith.addi %2, %c7_i32 : i32
    %29 = arith.index_cast %28 : i32 to index
    %30 = memref.load %arg3[%29] : memref<96xf32, #tpu.memory_space<smem>>
    %c8_i32 = arith.constant 8 : i32
    %31 = arith.addi %2, %c8_i32 : i32
    %32 = arith.index_cast %31 : i32 to index
    %33 = memref.load %arg3[%32] : memref<96xf32, #tpu.memory_space<smem>>
    %c9_i32 = arith.constant 9 : i32
    %34 = arith.addi %2, %c9_i32 : i32
    %35 = arith.index_cast %34 : i32 to index
    %36 = memref.load %arg3[%35] : memref<96xf32, #tpu.memory_space<smem>>
    %c10_i32 = arith.constant 10 : i32
    %37 = arith.addi %2, %c10_i32 : i32
    %38 = arith.index_cast %37 : i32 to index
    %39 = memref.load %arg3[%38] : memref<96xf32, #tpu.memory_space<smem>>
    %c11_i32 = arith.constant 11 : i32
    %40 = arith.addi %2, %c11_i32 : i32
    %41 = arith.index_cast %40 : i32 to index
    %42 = memref.load %arg3[%41] : memref<96xf32, #tpu.memory_space<smem>>
    %43 = vector.broadcast %9 : f32 to vector<1x256xf32>
    %44 = arith.mulf %43, %3 : vector<1x256xf32>
    %45 = vector.broadcast %12 : f32 to vector<1x256xf32>
    %46 = arith.mulf %45, %4 : vector<1x256xf32>
    %47 = arith.addf %44, %46 : vector<1x256xf32>
    %48 = vector.broadcast %15 : f32 to vector<1x256xf32>
    %49 = arith.addf %47, %48 : vector<1x256xf32>
    %50 = arith.mulf %49, %6 : vector<1x256xf32>
    %51 = vector.broadcast %36 : f32 to vector<1x256xf32>
    %52 = arith.addf %50, %51 : vector<1x256xf32>
    %53 = vector.broadcast %18 : f32 to vector<1x256xf32>
    %54 = arith.mulf %53, %3 : vector<1x256xf32>
    %55 = vector.broadcast %21 : f32 to vector<1x256xf32>
    %56 = arith.mulf %55, %4 : vector<1x256xf32>
    %57 = arith.addf %54, %56 : vector<1x256xf32>
    %58 = vector.broadcast %24 : f32 to vector<1x256xf32>
    %59 = arith.addf %57, %58 : vector<1x256xf32>
    %60 = arith.mulf %59, %6 : vector<1x256xf32>
    %61 = vector.broadcast %39 : f32 to vector<1x256xf32>
    %62 = arith.addf %60, %61 : vector<1x256xf32>
    %63 = vector.broadcast %27 : f32 to vector<1x256xf32>
    %64 = arith.mulf %63, %3 : vector<1x256xf32>
    %65 = vector.broadcast %30 : f32 to vector<1x256xf32>
    %66 = arith.mulf %65, %4 : vector<1x256xf32>
    %67 = arith.addf %64, %66 : vector<1x256xf32>
    %68 = vector.broadcast %33 : f32 to vector<1x256xf32>
    %69 = arith.addf %67, %68 : vector<1x256xf32>
    %70 = arith.mulf %69, %6 : vector<1x256xf32>
    %71 = vector.broadcast %42 : f32 to vector<1x256xf32>
    %72 = arith.addf %70, %71 : vector<1x256xf32>
    %cst = arith.constant 1.000000e-10 : f32
    %73 = vector.broadcast %cst : f32 to vector<1x256xf32>
    %74 = arith.addf %72, %73 : vector<1x256xf32>
    %cst_7 = arith.constant 1.000000e+00 : f32
    %75 = vector.broadcast %cst_7 : f32 to vector<1x256xf32>
    %76 = arith.divf %75, %74 : vector<1x256xf32>
    %77 = arith.mulf %52, %76 : vector<1x256xf32>
    %78 = arith.mulf %62, %76 : vector<1x256xf32>
    %79 = math.floor %77 : vector<1x256xf32>
    %80 = arith.fptosi %79 : vector<1x256xf32> to vector<1x256xi32>
    %c1_i32_8 = arith.constant 1 : i32
    %81 = vector.broadcast %c1_i32_8 : i32 to vector<1x256xi32>
    %82 = arith.addi %80, %81 : vector<1x256xi32>
    %83 = math.floor %78 : vector<1x256xf32>
    %84 = arith.fptosi %83 : vector<1x256xf32> to vector<1x256xi32>
    %c1_i32_9 = arith.constant 1 : i32
    %85 = vector.broadcast %c1_i32_9 : i32 to vector<1x256xi32>
    %86 = arith.addi %84, %85 : vector<1x256xi32>
    %c0_i32_10 = arith.constant 0 : i32
    %87 = vector.broadcast %c0_i32_10 : i32 to vector<1x256xi32>
    %88 = arith.cmpi sge, %80, %87 : vector<1x256xi32>
    %c15_i32 = arith.constant 15 : i32
    %89 = vector.broadcast %c15_i32 : i32 to vector<1x256xi32>
    %90 = arith.cmpi sle, %82, %89 : vector<1x256xi32>
    %91 = arith.andi %88, %90 : vector<1x256xi1>
    %c0_i32_11 = arith.constant 0 : i32
    %92 = vector.broadcast %c0_i32_11 : i32 to vector<1x256xi32>
    %93 = arith.cmpi sge, %84, %92 : vector<1x256xi32>
    %94 = arith.andi %91, %93 : vector<1x256xi1>
    %c15_i32_12 = arith.constant 15 : i32
    %95 = vector.broadcast %c15_i32_12 : i32 to vector<1x256xi32>
    %96 = arith.cmpi sle, %84, %95 : vector<1x256xi32>
    %97 = arith.andi %94, %96 : vector<1x256xi1>
    %98 = arith.extui %97 : vector<1x256xi1> to vector<1x256xi32>
    %99 = arith.sitofp %98 : vector<1x256xi32> to vector<1x256xf32>
    %c0_i32_13 = arith.constant 0 : i32
    %c15_i32_14 = arith.constant 15 : i32
    %100 = vector.broadcast %c0_i32_13 : i32 to vector<1x256xi32>
    %101 = arith.maxsi %100, %80 : vector<1x256xi32>
    %102 = vector.broadcast %c15_i32_14 : i32 to vector<1x256xi32>
    %103 = arith.minsi %102, %101 : vector<1x256xi32>
    %c0_i32_15 = arith.constant 0 : i32
    %c15_i32_16 = arith.constant 15 : i32
    %104 = vector.broadcast %c0_i32_15 : i32 to vector<1x256xi32>
    %105 = arith.maxsi %104, %82 : vector<1x256xi32>
    %106 = vector.broadcast %c15_i32_16 : i32 to vector<1x256xi32>
    %107 = arith.minsi %106, %105 : vector<1x256xi32>
    %c0_i32_17 = arith.constant 0 : i32
    %c15_i32_18 = arith.constant 15 : i32
    %108 = vector.broadcast %c0_i32_17 : i32 to vector<1x256xi32>
    %109 = arith.maxsi %108, %84 : vector<1x256xi32>
    %110 = vector.broadcast %c15_i32_18 : i32 to vector<1x256xi32>
    %111 = arith.minsi %110, %109 : vector<1x256xi32>
    %c0_i32_19 = arith.constant 0 : i32
    %c15_i32_20 = arith.constant 15 : i32
    %112 = vector.broadcast %c0_i32_19 : i32 to vector<1x256xi32>
    %113 = arith.maxsi %112, %86 : vector<1x256xi32>
    %114 = vector.broadcast %c15_i32_20 : i32 to vector<1x256xi32>
    %115 = arith.minsi %114, %113 : vector<1x256xi32>
    %116 = arith.sitofp %107 : vector<1x256xi32> to vector<1x256xf32>
    %117 = arith.subf %116, %77 : vector<1x256xf32>
    %cst_21 = arith.constant 1.000000e+00 : f32
    %118 = vector.broadcast %cst_21 : f32 to vector<1x256xf32>
    %119 = arith.subf %118, %117 : vector<1x256xf32>
    %120 = arith.sitofp %115 : vector<1x256xi32> to vector<1x256xf32>
    %121 = arith.subf %120, %78 : vector<1x256xf32>
    %cst_22 = arith.constant 1.000000e+00 : f32
    %122 = vector.broadcast %cst_22 : f32 to vector<1x256xf32>
    %123 = arith.subf %122, %121 : vector<1x256xf32>
    %124 = tpu.iota {dimensions = array<i32: 0>} : vector<16x1xi32>
    %125 = vector.broadcast %124 : vector<16x1xi32> to vector<16x256xi32>
    %126 = vector.broadcast %103 : vector<1x256xi32> to vector<16x256xi32>
    %127 = arith.cmpi eq, %125, %126 : vector<16x256xi32>
    %cst_23 = arith.constant 0.000000e+00 : f32
    %128 = vector.shape_cast %117 : vector<1x256xf32> to vector<1x256xf32>
    %129 = vector.broadcast %128 : vector<1x256xf32> to vector<16x256xf32>
    %130 = vector.broadcast %cst_23 : f32 to vector<16x256xf32>
    %131 = arith.select %127, %129, %130 : vector<16x256xi1>, vector<16x256xf32>
    %132 = vector.broadcast %124 : vector<16x1xi32> to vector<16x256xi32>
    %133 = vector.broadcast %107 : vector<1x256xi32> to vector<16x256xi32>
    %134 = arith.cmpi eq, %132, %133 : vector<16x256xi32>
    %cst_24 = arith.constant 0.000000e+00 : f32
    %135 = vector.shape_cast %119 : vector<1x256xf32> to vector<1x256xf32>
    %136 = vector.broadcast %135 : vector<1x256xf32> to vector<16x256xf32>
    %137 = vector.broadcast %cst_24 : f32 to vector<16x256xf32>
    %138 = arith.select %134, %136, %137 : vector<16x256xi1>, vector<16x256xf32>
    %139 = arith.addf %131, %138 : vector<16x256xf32>
    %140 = arith.truncf %139 : vector<16x256xf32> to vector<16x256xbf16>
    %141 = tpu.iota {dimensions = array<i32: 0>} : vector<16x1xi32>
    %142 = vector.broadcast %141 : vector<16x1xi32> to vector<16x256xi32>
    %143 = vector.broadcast %111 : vector<1x256xi32> to vector<16x256xi32>
    %144 = arith.cmpi eq, %142, %143 : vector<16x256xi32>
    %cst_25 = arith.constant 0.000000e+00 : f32
    %145 = vector.shape_cast %121 : vector<1x256xf32> to vector<1x256xf32>
    %146 = vector.broadcast %145 : vector<1x256xf32> to vector<16x256xf32>
    %147 = vector.broadcast %cst_25 : f32 to vector<16x256xf32>
    %148 = arith.select %144, %146, %147 : vector<16x256xi1>, vector<16x256xf32>
    %149 = vector.broadcast %141 : vector<16x1xi32> to vector<16x256xi32>
    %150 = vector.broadcast %115 : vector<1x256xi32> to vector<16x256xi32>
    %151 = arith.cmpi eq, %149, %150 : vector<16x256xi32>
    %cst_26 = arith.constant 0.000000e+00 : f32
    %152 = vector.shape_cast %123 : vector<1x256xf32> to vector<1x256xf32>
    %153 = vector.broadcast %152 : vector<1x256xf32> to vector<16x256xf32>
    %154 = vector.broadcast %cst_26 : f32 to vector<16x256xf32>
    %155 = arith.select %151, %153, %154 : vector<16x256xi1>, vector<16x256xf32>
    %156 = arith.addf %148, %155 : vector<16x256xf32>
    %c0_27 = arith.constant 0 : index
    %c0_28 = arith.constant 0 : index
    %c0_29 = arith.constant 0 : index
    %c0_30 = arith.constant 0 : index
    %157 = vector.load %arg7[%c0_27, %c0_28, %c0_29, %c0_30] : memref<1x1x48x16xbf16, #tpu.memory_space<vmem>>, vector<1x1x48x16xbf16>
    %158 = vector.shape_cast %157 : vector<1x1x48x16xbf16> to vector<48x16xbf16>
    %cst_31 = arith.constant dense<0.000000e+00> : vector<48x256xf32>
    %159 = tpu.matmul %158, %140, %cst_31 {dimension_numbers = #tpu.dot_dimension_numbers<[1], [0], [0], [1], [0, 0, 1, 1], [], []>} : vector<48x16xbf16>, vector<16x256xbf16>, vector<48x256xf32> -> vector<48x256xf32>
    %160 = vector.extract_strided_slice %159 {offsets = [0, 0], sizes = [16, 256], strides = [1, 1]} : vector<48x256xf32> to vector<16x256xf32>
    %161 = arith.mulf %160, %156 : vector<16x256xf32>
    %cst_32 = arith.constant dense<0.000000e+00> : vector<256xf32>
    %162 = vector.multi_reduction <add>, %161, %cst_32 [0] : vector<16x256xf32> to vector<256xf32>
    %163 = vector.shape_cast %162 : vector<256xf32> to vector<1x256xf32>
    %c0_33 = arith.constant 0 : index
    %c0_34 = arith.constant 0 : index
    %c0_35 = arith.constant 0 : index
    %c0_36 = arith.constant 0 : index
    %164 = vector.load %arg8[%c0_33, %c0_34, %c0_35, %c0_36] : memref<1x1x3x256xf32, #tpu.memory_space<vmem>>, vector<1x1x1x256xf32>
    %165 = vector.shape_cast %164 : vector<1x1x1x256xf32> to vector<1x256xf32>
    %166 = vector.shape_cast %163 : vector<1x256xf32> to vector<1x1x1x256xf32>
    tpu.vector_store %arg8[%c0_33, %c0_34, %c0_35, %c0_36], %166 {strides = array<i32>} : memref<1x1x3x256xf32, #tpu.memory_space<vmem>>, vector<1x1x1x256xf32>,
    %167 = vector.extract_strided_slice %159 {offsets = [16, 0], sizes = [16, 256], strides = [1, 1]} : vector<48x256xf32> to vector<16x256xf32>
    %168 = arith.mulf %167, %156 : vector<16x256xf32>
    %cst_37 = arith.constant dense<0.000000e+00> : vector<256xf32>
    %169 = vector.multi_reduction <add>, %168, %cst_37 [0] : vector<16x256xf32> to vector<256xf32>
    %170 = vector.shape_cast %169 : vector<256xf32> to vector<1x256xf32>
    %c0_38 = arith.constant 0 : index
    %c0_39 = arith.constant 0 : index
    %c1 = arith.constant 1 : index
    %c0_40 = arith.constant 0 : index
    %171 = vector.load %arg8[%c0_38, %c0_39, %c1, %c0_40] : memref<1x1x3x256xf32, #tpu.memory_space<vmem>>, vector<1x1x1x256xf32>
    %172 = vector.shape_cast %171 : vector<1x1x1x256xf32> to vector<1x256xf32>
    %173 = vector.shape_cast %170 : vector<1x256xf32> to vector<1x1x1x256xf32>
    tpu.vector_store %arg8[%c0_38, %c0_39, %c1, %c0_40], %173 {strides = array<i32>} : memref<1x1x3x256xf32, #tpu.memory_space<vmem>>, vector<1x1x1x256xf32>,
    %174 = vector.extract_strided_slice %159 {offsets = [32, 0], sizes = [16, 256], strides = [1, 1]} : vector<48x256xf32> to vector<16x256xf32>
    %175 = arith.mulf %174, %156 : vector<16x256xf32>
    %cst_41 = arith.constant dense<0.000000e+00> : vector<256xf32>
    %176 = vector.multi_reduction <add>, %175, %cst_41 [0] : vector<16x256xf32> to vector<256xf32>
    %177 = vector.shape_cast %176 : vector<256xf32> to vector<1x256xf32>
    %c0_42 = arith.constant 0 : index
    %c0_43 = arith.constant 0 : index
    %c2 = arith.constant 2 : index
    %c0_44 = arith.constant 0 : index
    %178 = vector.load %arg8[%c0_42, %c0_43, %c2, %c0_44] : memref<1x1x3x256xf32, #tpu.memory_space<vmem>>, vector<1x1x1x256xf32>
    %179 = vector.shape_cast %178 : vector<1x1x1x256xf32> to vector<1x256xf32>
    %180 = vector.shape_cast %177 : vector<1x256xf32> to vector<1x1x1x256xf32>
    tpu.vector_store %arg8[%c0_42, %c0_43, %c2, %c0_44], %180 {strides = array<i32>} : memref<1x1x3x256xf32, #tpu.memory_space<vmem>>, vector<1x1x1x256xf32>,
    %c0_45 = arith.constant 0 : index
    %c0_46 = arith.constant 0 : index
    %c0_47 = arith.constant 0 : index
    %c0_48 = arith.constant 0 : index
    %181 = vector.load %arg9[%c0_45, %c0_46, %c0_47, %c0_48] : memref<1x1x1x256xf32, #tpu.memory_space<vmem>>, vector<1x1x1x256xf32>
    %182 = vector.shape_cast %181 : vector<1x1x1x256xf32> to vector<1x256xf32>
    %183 = vector.shape_cast %99 : vector<1x256xf32> to vector<1x1x1x256xf32>
    tpu.vector_store %arg9[%c0_45, %c0_46, %c0_47, %c0_48], %183 {strides = array<i32>} : memref<1x1x1x256xf32, #tpu.memory_space<vmem>>, vector<1x1x1x256xf32>,
    return
  }
  func.func @transform_0(%arg0: i32, %arg1: i32, %arg2: i32) -> i32 {
    %c0_i32 = arith.constant 0 : i32
    %c0_i32_0 = arith.constant 0 : i32
    return %c0_i32 : i32
  }
  func.func @transform_1(%arg0: i32, %arg1: i32, %arg2: i32) -> (i32, i32) {
    %c0_i32 = arith.constant 0 : i32
    %c0_i32_0 = arith.constant 0 : i32
    return %c0_i32, %arg2 : i32, i32
  }
  func.func @transform_2(%arg0: i32, %arg1: i32, %arg2: i32) -> (i32, i32) {
    %c0_i32 = arith.constant 0 : i32
    %c0_i32_0 = arith.constant 0 : i32
    return %c0_i32, %arg2 : i32, i32
  }
  func.func @transform_3(%arg0: i32, %arg1: i32, %arg2: i32) -> (i32, i32, i32) {
    %c0_i32 = arith.constant 0 : i32
    %c0_i32_0 = arith.constant 0 : i32
    return %arg0, %c0_i32, %arg2 : i32, i32, i32
  }
  func.func @transform_4(%arg0: i32, %arg1: i32, %arg2: i32) -> (i32, i32, i32, i32) {
    %c0_i32 = arith.constant 0 : i32
    %c0_i32_0 = arith.constant 0 : i32
    %c0_i32_1 = arith.constant 0 : i32
    return %arg0, %arg1, %c0_i32, %c0_i32_0 : i32, i32, i32, i32
  }
  func.func @transform_5(%arg0: i32, %arg1: i32, %arg2: i32) -> (i32, i32, i32, i32) {
    %c0_i32 = arith.constant 0 : i32
    %c0_i32_0 = arith.constant 0 : i32
    return %arg0, %arg1, %c0_i32, %arg2 : i32, i32, i32, i32
  }
  func.func @transform_6(%arg0: i32, %arg1: i32, %arg2: i32) -> (i32, i32, i32, i32) {
    %c0_i32 = arith.constant 0 : i32
    %c0_i32_0 = arith.constant 0 : i32
    return %arg0, %arg1, %c0_i32, %arg2 : i32, i32, i32, i32
  }
}

</mosaic_0001>

<bundles_post_ra>
// kernel: tile.9
= control target key start
LH: loop header
LB: loop body
LE: loop exit
PB: predicated region body
PF: predicated region fallthrough
CT: control target
= control target key end

     0   :  { %s7_s6 = smov 3  ;;  %s21_s9 = smov 3  ;;  %vm4_vm0 = vcmask 130048   ;;  %vm11_vm1 = vcmask 1048448   ;;  %vm18_vm2 = vcmask 917248   ;;  %vm25_vm3 = vcmask 786048   ;;  %s128_s0 = inlined_call_operand.vmem [shape: f32[16,16], index: 0, kind: input, shape index: {}]   ;;  %s129_s1 = inlined_call_operand.vmem [shape: f32[1,256], index: 1, kind: output, shape index: {}]  }
   0x1   :  { %v66_v0 = vld [vmem:[%s128_s0 + $0x7] ss:$8 sm:%s7_s6]   ;;  %s81_s10 = smov 112   ;;  %v68_v1 = vld [vmem:[%s128_s0 + $0x5] ss:$8 sm:%s21_s9]   ;;  %s14_s13 = smov 3 }
   0x2   :  { %9 = vrot.lane.b32.xlu0 %v66_v0, %s81_s10  ;;  %s82_s14 = smov 80   ;;  %v67_v2 = vld [vmem:[%s128_s0 + $0x6] ss:$8 sm:%s14_s13]   ;;  %s28_s17 = smov 3  ;;  %vm32_vm4 = vcmask 654848   ;;  %vm39_vm5 = vcmask 523648  }
   0x3   :  { %23 = vrot.lane.b32.xlu1 %v68_v1, %s82_s14  ;;  %v69_v3 = vld [vmem:[%s128_s0 + $0x4] ss:$8 sm:%s28_s17]   ;;  %s35_s20 = smov 3  ;;  %s42_s21 = smov 3  ;;  %vm46_vm6 = vcmask 392448   ;;  %vm53_vm7 = vcmask 261248  }
   0x4   :  { %s83_s22 = smov 96   ;;  %s84_s23 = smov 64   ;;  %v70_v4 = vld [vmem:[%s128_s0 + $0x3] ss:$8 sm:%s35_s20]   ;;  %v71_v5 = vld [vmem:[%s128_s0 + $0x2] ss:$8 sm:%s42_s21]  }
   0x5   :  { %s2_s26 = smov 3  ;;  %s49_s29 = smov 3 }
   0x6   :  { %16 = vrot.lane.b32.xlu0 %v67_v2, %s83_s22  ;;  %v3_v6 = vld [vmem:[%s128_s0] ss:$8 sm:%s2_s26]   ;;  %s85_s3 = smov 48   ;;  %s86_s4 = smov 32  }
   0x7   :  { %30 = vrot.lane.b32.xlu1 %v69_v3, %s84_s23  ;;  %5 = vst.msk [vmem:[#allocation0] ss:$8 sm:$0x3] %vm4_vm0, %v3_v6   ;;  %v72_v7 = vld [vmem:[%s128_s0 + $0x1] ss:$8 sm:%s49_s29]   ;;  %s87_s0 = smov 16  }
   0xa   :  { %37 = vrot.lane.b32.xlu0 %v70_v4, %s85_s3 }
   0xb   :  { %44 = vrot.lane.b32.xlu1 %v71_v5, %s86_s4 }
   0xe   :  { %51 = vrot.lane.b32.xlu0 %v72_v7, %s87_s0 }
  0x74   :  { %v10_v8 = vpop.permute.xlu0 %9  }
  0x75   :  { %12 = vst.msk [vmem:[#allocation0] ss:$8 sm:$0x3] %vm11_vm1, %v10_v8   ;;  %v24_v9 = vpop.permute.xlu1 %23  }
  0x78   :  { %v17_v10 = vpop.permute.xlu0 %16  }
  0x79   :  { %19 = vst.msk [vmem:[#allocation0] ss:$8 sm:$0x3] %vm18_vm2, %v17_v10   ;;  %v31_v11 = vpop.permute.xlu1 %30  }
  0x7a   :  { %26 = vst.msk [vmem:[#allocation0] ss:$8 sm:$0x3] %vm25_vm3, %v24_v9  }
  0x7b   :  { %33 = vst.msk [vmem:[#allocation0] ss:$8 sm:$0x3] %vm32_vm4, %v31_v11  }
  0x7c   :  { %v38_v12 = vpop.permute.xlu0 %37  }
  0x7d   :  { %40 = vst.msk [vmem:[#allocation0] ss:$8 sm:$0x3] %vm39_vm5, %v38_v12   ;;  %v45_v13 = vpop.permute.xlu1 %44  }
  0x7e   :  { %47 = vst.msk [vmem:[#allocation0] ss:$8 sm:$0x3] %vm46_vm6, %v45_v13  }
  0x80   :  { %v52_v14 = vpop.permute.xlu0 %51  }
  0x81   :  { %54 = vst.msk [vmem:[#allocation0] ss:$8 sm:$0x3] %vm53_vm7, %v52_v14  }
  0x88   :  { %v58_v15 = vld [vmem:[#allocation0] sm:$0x1]  ;;  %v62_v16 = vld [vmem:[#allocation0 + $0x8] sm:$0x1] }
  0x89   :  { %60 = vst [vmem:[%s129_s1] sm:$0x1] %v58_v15  ;;  %73 = vst [vmem:[%s129_s1 + $0x1] sm:$0x1] %v62_v16 }

// kernel: sub.2
= control target key start
LH: loop header
LB: loop body
LE: loop exit
PB: predicated region body
PF: predicated region fallthrough
CT: control target
= control target key end

     0   :  { %s34_s0 = inlined_call_operand.vmem [shape: f32[2,3], index: 0, kind: input, shape index: {}]   ;;  %s35_s1 = inlined_call_operand.vmem [shape: f32[2,3], index: 1, kind: input, shape index: {}]   ;;  %s36_s2 = inlined_call_operand.vmem [shape: f32[2,3], index: 2, kind: output, shape index: {}]  }
   0x1   :  { %v3_v0 = vld [vmem:[%s34_s0] sm:$0x3] }
   0x2   :  { %v4_v1 = vld [vmem:[%s35_s1] sm:$0x3] }
   0x3   :  { %v7_v2 = vsub.f32 %v3_v0, %v4_v1 }
   0x5   :  { %9 = vst [vmem:[%s36_s2] sm:$0x3] %v7_v2 }

// kernel: custom-call.15
= control target key start
LH: loop header
LB: loop body
LE: loop exit
PB: predicated region body
PF: predicated region fallthrough
CT: control target
= control target key end

     0   :  { %5 = vsyncpa [#allocation6], 0  ;;  %s896_s0 = inlined_call_operand.vmem [shape: f32[2,3,3], index: 0, kind: input, shape index: {}]   ;;  %s897_s1 = inlined_call_operand.vmem [shape: f32[2,3,3], index: 1, kind: output, shape index: {0}]   ;;  %s898_s2 = inlined_call_operand.hbm [shape: s32[2,3], index: 2, kind: output, shape index: {1}]   ;;  %s899_s3 = inlined_call_operand.vmem [shape: s32[2,3], index: 3, kind: output, shape index: {2}]  }
   0x1   :  { %7 = vsyncpa [#allocation6 + $0x1], 0  ;;  %s715_s12 = smov 0   ;;  %s717_s13 = smov 0  }
   0x2   :  { %s719_s14 = smov 0   ;;  %s721_s15 = smov 0  }
   0x3 LB: > { %s736_s16 = sadd.s32 4294967295, %s687_s15   ;;  %s550_s17 = sadd.s32 4294967294, %s687_s15   ;;  %s687_s15 = sphi %s721_s15, %s907_s15   ;;  %s683_s14 = sphi %s719_s14, %s906_s14   ;;  %s679_s13 = sphi %s717_s13, %s905_s13   ;;  %s675_s12 = sphi %s715_s12, %s904_s12  }
   0x4   : > { %s740_s18 = sadd.s32 1, %s687_s15   ;;  %s17_s19 = sshrl.u32 %s687_s15, 3 }
   0x5   : > { %s18_s20 = sshrl.u32 %s740_s18, 3  ;;  %s22_s21 = sadd.s32 1, %s683_s14 }
   0x6   : > { %s19_s22 = ssub.s32 %s17_s19, %s18_s20  ;;  %p32_p0 = scmp.ne.s32.totalorder %s683_s14, %s679_s13 }
   0x7   : > { %p20_p1 = scmp.eq.s32.totalorder %s19_s22, 0  ;;  %p33_p2 = scmp.eq.s32.totalorder %s736_s16, 1 }
   0x8   : > { %p38_p3 = scmp.ne.s32.totalorder %s679_s13, %s675_s12  ;;  %p39_p4 = scmp.eq.s32.totalorder %s550_s17, 1 }
   0x9   : > { %s751_s23 = scalar_select %p20_p1, %s683_s14, %s22_s21  }
   0xa   : > { %p753_p5 = por %p33_p2, %p32_p0  ;;  %p757_p6 = por %p39_p4, %p38_p3 }
   0xb   : > { %p552_p7 = scmp.ge.s32.totalorder %s687_s15, 2 }
   0xc   : > { %s85_s26 = sand.u32 (!%p552_p7), 1, %s687_s15   ;;  %s554_s27 = sshll.u32 (!%p552_p7), %s687_s15, 2 }
   0xd   : > { %83 = sbr.rel (%p552_p7) target bundleno = 20 (0x14), region = 16  ;;  %s553_s28 = sshll.u32 (!%p552_p7), %s85_s26, 2 }
   0xe   : > { %s89_s4 = scalar_lea.vmem (!%p552_p7), %s896_s0, %s554_s27  ;;  %s87_s5 = scalar_lea.vmem (!%p552_p7), [#allocation1], %s553_s28 }
   0xf   : > { %v105_v0 = vld [vmem:[%s89_s4] sm:$0xf] (!%p552_p7) }
  0x10   : > { %106 = vst [vmem:[%s87_s5] sm:$0xf] (!%p552_p7), %v105_v0 }
  0x14 PF: > { %p555_p8 = scmp.ge.s32.totalorder %s687_s15, 1  ;;  %p122_p9 = scmp.lt.s32.totalorder %s687_s15, 3 }
  0x16   : > { %p123_p10 = pnand %p555_p8, %p122_p9 }
  0x18   : > { %126 = sbr.rel (%p123_p10) target bundleno = 451 (0x1c3), region = 50 }
  0x1f   : > { %s133_s6 = sand.u32 1, %s736_s16   ;;  %s144_s7 = sand.u32 1, %s679_s13   ;;  %v166_v1 = vlaneseq  ;;  %v693_v4 = vmov 0  }
  0x20   : > { %s773_s8 = sshll.u32 %s133_s6, 2  ;;  %s777_s9 = sshll.u32 %s144_s7, 1 }
  0x21   : > { %v780_v2 = vshrl.u32 %v166_v1, 7  ;;  %s135_s10 = scalar_lea.vmem [#allocation1], %s773_s8  ;;  %s161_s11 = sand.u32 7, %s736_s16  }
  0x22   : > { %v155_v3 = vld [vmem:[%s135_s10] sm:$0xf]  ;;  %s785_s17 = scalar_lea.vmem [#allocation4], %s161_s11  ;;  %s139_s19 = scalar_lea.vmem [#allocation3], %s773_s8 }
  0x23   : > { %156 = vst [vmem:[#allocation0] sm:$0xf] %v155_v3  ;;  %170 = vst [vmem:[#allocation9] sm:$0xff] %v780_v2  ;;  %s146_s20 = scalar_lea.vmem [#allocation5], %s777_s9  ;;  %s152_s21 = scalar_lea.vmem [#allocation8], %s777_s9 }
  0x24   : > { %165 = vst [vmem:[%s785_s17] sm:$0x1] %v693_v4  ;;  %s791_s22 = scalar_lea.vmem [#allocation7], %s161_s11  ;;  %s793_s26 = smov 0  }
  0x2a   : > { %v159_v5 = vld [vmem:[#allocation0] sm:$0xff] }
  0x2b   : > { %160 = vst [vmem:[#allocation2] sm:$0xff] %v159_v5 }
  0x2c LB: >> { %vm186_vm0 = vcmp.lt.s32.totalorder %v780_v2, 3  ;;  %v800_v8 = vstv %s691_s26  ;;  %s227_s27 = ssub.s32 128, %s691_s26  ;;  %v233_v38 = vand.u32 127, %v166_v1  ;;  %v236_v40 = vld [vmem:[%s785_s17] ss:$0 sm:$0xff]  ;;  %s239_s28 = scalar_lea.vmem [#allocation2], %s691_s26  ;;  %s691_s26 = sphi %s793_s26, %s176_s26  }
  0x2d   : >> { %vm185_vm1 = vcmp.ge.s32.totalorder %v780_v2, %v800_v8  ;;  %s245_s30 = scalar_lea.vmem [#allocation9], %s691_s26  ;;  %vm265_vm15 = vcmp.gt.s32.totalorder %v780_v2, %v800_v8  ;;  %s176_s26 = sadd.s32 1, %s691_s26  }
  0x2e   : >> { %vm187_vm3 = vmand %vm185_vm1, %vm186_vm0  ;;  %vm257_vm12 = vcmp.gt.s32.totalorder %v233_v38, %v800_v8  ;;  %vm234_vm13 = vcmp.eq.s32.totalorder %v233_v38, %v800_v8  ;;  %v247_v42 = vld [vmem:[%s245_s30] ss:$0 sm:$0xff]  ;;  %p173_p11 = scmp.ge.s32.totalorder %s176_s26, 3  }
  0x2f   : >> { %vm269_vm1 = vmand %vm265_vm15, %vm234_vm13  ;;  %s900_s6 = sshrl.u32 (%p173_p11), %s736_s16, 3  ;;  %s564_s10 = sshll.u32 (%p173_p11), %s736_s16, 2 }
  0x30   : > { %s565_s11 = sshll.u32 (%p173_p11), %s900_s6, 5 }
  0x32   : >> { %v181_v6 = vld [vmem:[#allocation2] sm:$0xff]  ;;  %v241_v41 = vld [vmem:[%s239_s28] ss:$0 sm:$0xff] }
  0x33   : >> { %v182_v7 = vand.u32 2147483647, %v181_v6 }
  0x35   : >> { %vm560_vm2 = vcmp.gt.f32.partialorder %v182_v7, -inf }
  0x36   : >> { %vm189_vm4 = vmand %vm187_vm3, %vm560_vm2 }
  0x37   : >> { %v190_v9 = vsel %vm189_vm4, %v780_v2, %v800_v8  ;;  %v191_v10 = vsel %vm189_vm4, %v182_v7, -inf }
  0x38   : >> { %v192_v11 = vrot.slane %v191_v10, 1  ;;  %v193_v12 = vrot.slane %v190_v9, 1 }
  0x3a   : >> { %vm194_vm5 = vcmp.ge.f32.partialorder %v192_v11, %v191_v10  ;;  %v197_v13 = vrot.slane %v192_v11, 1  ;;  %v198_v14 = vrot.slane %v193_v12, 1 }
  0x3b   : >> { %v195_v15 = vsel %vm194_vm5, %v192_v11, %v191_v10  ;;  %v196_v16 = vsel %vm194_vm5, %v193_v12, %v190_v9 }
  0x3c   : >> { %vm199_vm6 = vcmp.ge.f32.partialorder %v197_v13, %v195_v15  ;;  %v202_v17 = vrot.slane %v197_v13, 1  ;;  %v203_v18 = vrot.slane %v198_v14, 1 }
  0x3d   : >> { %v200_v19 = vsel %vm199_vm6, %v197_v13, %v195_v15  ;;  %v201_v20 = vsel %vm199_vm6, %v198_v14, %v196_v16 }
  0x3e   : >> { %vm204_vm7 = vcmp.ge.f32.partialorder %v202_v17, %v200_v19  ;;  %v207_v21 = vrot.slane %v202_v17, 1  ;;  %v208_v22 = vrot.slane %v203_v18, 1 }
  0x3f   : >> { %v205_v23 = vsel %vm204_vm7, %v202_v17, %v200_v19  ;;  %v206_v24 = vsel %vm204_vm7, %v203_v18, %v201_v20 }
  0x40   : >> { %vm209_vm8 = vcmp.ge.f32.partialorder %v207_v21, %v205_v23  ;;  %v212_v25 = vrot.slane %v207_v21, 1  ;;  %v213_v26 = vrot.slane %v208_v22, 1 }
  0x41   : >> { %v210_v27 = vsel %vm209_vm8, %v207_v21, %v205_v23  ;;  %v211_v28 = vsel %vm209_vm8, %v208_v22, %v206_v24 }
  0x42   : >> { %vm214_vm9 = vcmp.ge.f32.partialorder %v212_v25, %v210_v27  ;;  %v217_v29 = vrot.slane %v212_v25, 1  ;;  %v218_v30 = vrot.slane %v213_v26, 1 }
  0x43   : >> { %v215_v31 = vsel %vm214_vm9, %v212_v25, %v210_v27  ;;  %v216_v32 = vsel %vm214_vm9, %v213_v26, %v211_v28 }
  0x44   : >> { %vm219_vm10 = vcmp.ge.f32.partialorder %v217_v29, %v215_v31  ;;  %v222_v33 = vrot.slane %v217_v29, 1  ;;  %v223_v34 = vrot.slane %v218_v30, 1 }
  0x45   : >> { %v220_v35 = vsel %vm219_vm10, %v217_v29, %v215_v31  ;;  %v221_v36 = vsel %vm219_vm10, %v218_v30, %v216_v32 }
  0x46   : >> { %vm224_vm11 = vcmp.ge.f32.partialorder %v222_v33, %v220_v35 }
  0x47   : >> { %v226_v37 = vsel %vm224_vm11, %v223_v34, %v221_v36 }
  0x48   : >> { %228 = vrot.lane.b32.xlu0 %v226_v37, %s227_s27  ;;  %s357_s27 = scalar_lea.vmem (%p173_p11), %s897_s1, %s564_s10 }
  0xba   : >> { %v229_v39 = vpop.permute.xlu0 %228 }
  0xbb   : >> { %569 = vpush %v229_v39 }
  0xec   : >> { %s570_s29 = spop %569 }
  0xed   : >> { %v235_v43 = vstv %s570_s29  ;;  %s240_s4 = scalar_lea.vmem [#allocation2], %s570_s29  ;;  %s246_s5 = scalar_lea.vmem [#allocation9], %s570_s29 }
  0xee   : >> { %v242_v44 = vld [vmem:[%s240_s4] ss:$0 sm:$0xff]  ;;  %v237_v46 = vsel %vm234_vm13, %v235_v43, %v236_v40 }
  0xef   : >> { %v248_v45 = vld [vmem:[%s246_s5] ss:$0 sm:$0xff]  ;;  %243 = vst [vmem:[%s240_s4] sm:$0x1] %v241_v41  ;;  %vm251_vm14 = vcmp.ne.f32.partialorder %v242_v44, 0.0  ;;  %238 = vst [vmem:[%s785_s17] sm:$0x1] %v237_v46  ;;  %v258_v53 = vsel %vm257_vm12, %v242_v44, 0.0 }
  0xf0   : >> { %249 = vst [vmem:[%s246_s5] sm:$0x1] %v247_v42  ;;  %244 = vst [vmem:[%s239_s28] sm:$0x1] %v242_v44  ;;  %s399_s4 = sshll.u32 (%p173_p11), %s146_s20, 4  ;;  %s348_s5 = scalar_lea.sflag (%p173_p11), [#allocation6], %s144_s7  ;;  %s400_s4 = int_to_ptr.vmem [resolvable:$true] %s399_s4 }
  0xf1   : >> { %250 = vst [vmem:[%s245_s30] sm:$0x1] %v248_v45  ;;  %vm252_vm0 = vmand %vm234_vm13, %vm251_vm14  ;;  %s843_s30 = scalar_lea.hbm (%p173_p11), %s898_s2, %s565_s11  ;;  %s621_s6 = scalar_lea.vmem (%p173_p11), %s400_s4, 32 }
  0xf2   : >> { %v253_v47 = vsel %vm252_vm0, %v242_v44, 1.0  ;;  %p622_p12 = scmp.ne.s32.totalorder (%p173_p11), %s400_s4, %s621_s6  ;;  %s694_s17 = smov (%p173_p11), [#allocation5]  }
  0xf3   : >> { %v266_v48 = vsel %vm265_vm15, %v253_v47, 1.0  ;;  %s625_s10 = sshll.u32 (%p173_p11), %s694_s17, 4  ;;  %s626_s10 = int_to_ptr.vmem [resolvable:$false] %s625_s10 }
  0xf4   : >> { %619 = vrcp.f32 %v266_v48  ;;  %p623_p13 = pnand (%p173_p11), %p622_p12, %p753_p5  ;;  %s627_s8 = scalar_lea.vmem (%p173_p11), %s626_s10, 64 }
  0xf5   : > { %p628_p1 = scmp.lt.s32.totalorder (%p173_p11), %s400_s4, %s626_s10  ;;  %p629_p2 = scmp.lt.s32.totalorder (%p173_p11), %s627_s8, %s621_s6 }
  0xf6   : > { %v334_v59 = vld [vmem:[#allocation4] sm:$0x3] (%p173_p11)  ;;  %p624_p0 = pneg (%p173_p11), %p623_p13 }
  0xf7   : >> { %v262_v50 = vld [vmem:[#allocation2] sm:$0xff]  ;;  %336 = vst [vmem:[%s146_s20] sm:$0x3] (%p173_p11), %v334_v59  ;;  %p630_p3 = por (%p173_p11), %p629_p2, %p628_p1 }
  0xf8   : > { %v276_v57 = vld [vmem:[#allocation9] sm:$0xff] (%p173_p11) }
  0xf9   : > { %p631_p4 = pnand (%p173_p11), %p630_p3, %p624_p0 }
  0xfe   : >> { %v620_v49 = vpop.eup %619 }
  0xff   : >> { %v268_v51 = vmul.f32 %v620_v49, %v262_v50 }
 0x101   : >> { %v270_v52 = vsel %vm269_vm1, %v268_v51, 0.0 }
 0x102   : >> { %271 = vadd.xlane.f32.xlu0 %v270_v52 }
 0x12f   : > { %292 = vxpose.xlu0.b32.start.end [1/1] (short) (narrow) (%p173_p11), %v276_v57, 8 }
 0x18e   : > { %175 = sbr.rel (!%p173_p11) target bundleno = 44 (0x2c), region = 202 }
 0x18f   : >> { %v272_v54 = vpop.xlane.xlu0 %271 }
 0x190   : >> { %v273_v55 = vmul.f32 %v272_v54, %v258_v53 }
 0x192   : >> { %v274_v56 = vsub.f32 %v268_v51, %v273_v55 }
 0x194   : >> { %275 = vst [vmem:[#allocation2] sm:$0xff] %v274_v56 }
 0x19b   : > { %v328_v58 = vld [vmem:[#allocation2] sm:$0xf] }
 0x19c   : > { %330 = vst [vmem:[%s139_s19] sm:$0xf] %v328_v58 }
 0x1a3   : > { %v373_v60 = vld [vmem:[%s139_s19] sm:$0xf] }
 0x1a4   : > { %374 = vst [vmem:[%s357_s27] sm:$0xf] %v373_v60 }
 0x1a5   : > { %634 = shalt.err (!%p631_p4)
}
 0x1a6   : > { %s635_s7 = scalar_lea.hbm %s843_s30, 32  ;;  %s639_s11 = scalar_lea.hbm %s898_s2, 32 }
 0x1a7   : > { %p636_p8 = scmp.ne.s32.totalorder %s843_s30, %s635_s7  ;;  %p640_p11 = scmp.lt.u32.totalorder %s843_s30, %s898_s2 }
 0x1a8   : > { %p641_p12 = scmp.lt.u32.totalorder %s639_s11, %s635_s7  ;;  %p643_p0 = scmp.lt.u32.totalorder %s635_s7, %s843_s30 }
 0x1a9   : > { %p637_p9 = pnand %p636_p8, %p753_p5 }
 0x1aa   : > { %p642_p13 = por %p641_p12, %p640_p11 }
 0x1ab   : > { %p638_p10 = pneg %p637_p9 }
 0x1ac   : > { %p644_p1 = por %p643_p0, %p642_p13 }
 0x1ae   : > { %p645_p2 = pnand %p644_p1, %p638_p10 }
 0x1b0   : > { %648 = shalt.err (!%p645_p2)
}
 0x1b1   : > { %571 = dma.vmem_to_hbm [thread:$0]  (%p753_p5), %s400_s4, 32, %s843_s30, %s348_s5   ;;  %v308_v61 = vpop.trf.xlu0 }
 0x1b2   : > { %324 = vst [vmem:[%s791_s22] sm:$0x1] %v308_v61  ;;  %s903_s6 = sshrl.u32 (%p753_p5), %s736_s16, 3 }
 0x1b3   : > { %s566_s28 = sshll.u32 (%p753_p5), %s903_s6, 1 }
 0x1b4   : > { %405 = sbr.rel (!%p753_p5) target bundleno = 451 (0x1c3), region = 96  ;;  %s408_s10 = scalar_lea.vmem (%p753_p5), %s899_s3, %s566_s28 }
 0x1b9   : > { %v340_v62 = vld [vmem:[#allocation7] sm:$0x3] }
 0x1ba   : > { %342 = vst [vmem:[%s152_s21] sm:$0x3] %v340_v62 }
 0x1c1   : > { %v424_v63 = vld [vmem:[%s152_s21] sm:$0x3] }
 0x1c2   : > { %425 = vst [vmem:[%s408_s10] sm:$0x3] %v424_v63 }
 0x1c3 PF: > { %s452_s22 = sand.u32 1, %s675_s12   ;;  %p574_p5 = pnand %p552_p7, %p757_p6 }
 0x1c4   : > { %s453_s24 = scalar_lea.sflag [#allocation6], %s452_s22 }
 0x1c5   : > { %670 = dma.done.wait (!%p574_p5), %s453_s24, 32  }
 0x1c6   : > { %672 = vsyncadd (!%p574_p5), %s453_s24, 4294967264  ;;  %p10_p3 = scmp.ge.s32.totalorder %s740_s18, 4   ;;  %s904_s12 = smov %s679_s13 }
 0x1c7   : > { %s905_s13 = smov %s683_s14  ;;  %s906_s14 = smov %s751_s23 }
 0x1c8   : > { %s907_s15 = smov %s740_s18  ;;  %12 = sbr.rel (!%p10_p3) target bundleno = 3 (0x3), region = 213 }
 0x1cf   :  { %465 = vsyncpa [#allocation6], 1 }
 0x1d0   :  { %467 = vsyncpa [#allocation6 + $0x1], 1 }

// kernel: custom-call.16
= control target key start
LH: loop header
LB: loop body
LE: loop exit
PB: predicated region body
PF: predicated region fallthrough
CT: control target
= control target key end

     0   :  { %s342_s6 = smov 0   ;;  %s344_s7 = smov 0   ;;  %s389_s0 = inlined_call_operand.vmem [shape: f32[2,1,3,3], index: 0, kind: input, shape index: {}]   ;;  %s390_s1 = inlined_call_operand.vmem [shape: f32[2,1,3,3], index: 1, kind: output, shape index: {}]  }
   0x1   :  { %s346_s8 = smov 0  }
   0x2 LB: > { %s268_s9 = sadd.s32 4294967295, %s329_s8   ;;  %s33_s10 = sadd.s32 1, %s325_s7  ;;  %s329_s8 = sphi %s346_s8, %s7_s8   ;;  %s325_s7 = sphi %s344_s7, %s392_s7   ;;  %s321_s6 = sphi %s342_s6, %s391_s6  }
   0x3   : > { %p35_p0 = scmp.ge.s32.totalorder %s33_s10, 2  ;;  %p270_p1 = scmp.ge.s32.totalorder %s329_s8, 2 }
   0x4   : > { %s49_s11 = sand.u32 (!%p270_p1), 1, %s329_s8   ;;  %s272_s12 = sshll.u32 (!%p270_p1), %s325_s7, 2 }
   0x5   : > { %s394_s10 = smov (%p35_p0, %s33_s10), 0  ;;  %47 = sbr.rel (%p270_p1) target bundleno = 12 (0xc), region = 16 }
   0x6   : > { %s271_s13 = sshll.u32 (!%p270_p1), %s49_s11, 2  ;;  %s56_s16 = scalar_lea.vmem (!%p270_p1), %s389_s0, %s272_s12 }
   0x7   : > { %v72_v0 = vld [vmem:[%s56_s16] sm:$0xf] (!%p270_p1)  ;;  %s51_s17 = scalar_lea.vmem (!%p270_p1), [#allocation1], %s271_s13 }
   0x8   : > { %73 = vst [vmem:[%s51_s17] sm:$0xf] (!%p270_p1), %v72_v0 }
   0xc PF: > { %p273_p2 = scmp.ge.s32.totalorder %s329_s8, 1  ;;  %p89_p3 = scmp.lt.s32.totalorder %s329_s8, 3 }
   0xe   : > { %p90_p4 = pnand %p273_p2, %p89_p3 }
  0x10   : > { %93 = sbr.rel (%p90_p4) target bundleno = 511 (0x1ff), region = 50 }
  0x17   : > { %s369_s18 = sand.u32 1, %s268_s9   ;;  %v111_v1 = vlaneseq  ;;  %v331_v11 = vmov -1.0   ;;  %s277_s22 = sshll.u32 %s321_s6, 2 }
  0x18   : > { %s274_s19 = sshll.u32 %s369_s18, 2  ;;  %s177_s25 = scalar_lea.vmem %s390_s1, %s277_s22 }
  0x19   : > { %s102_s20 = scalar_lea.vmem [#allocation1], %s274_s19  ;;  %v112_v3 = vand.u32 127, %v111_v1  ;;  %v115_v4 = vshrl.u32 %v111_v1, 7  ;;  %s106_s21 = scalar_lea.vmem [#allocation3], %s274_s19 }
  0x1a   : > { %v109_v2 = vld [vmem:[%s102_s20] sm:$0xf] }
  0x1b   : > { %110 = vst [vmem:[#allocation0] sm:$0xf] %v109_v2  ;;  %vm113_vm0 = vcmp.lt.s32.totalorder %v112_v3, 3  ;;  %vm122_vm1 = vcmp.le.s32.totalorder %v115_v4, %v112_v3  ;;  %vm117_vm2 = vcmp.eq.s32.totalorder %v115_v4, %v112_v3  ;;  %vm136_vm4 = vcmp.eq.s32.totalorder %v112_v3, 2 }
  0x1c   : > { %vm123_vm3 = vmand %vm122_vm1, %vm113_vm0  ;;  %vm133_vm5 = vcmp.eq.s32.totalorder %v112_v3, %v115_v4  ;;  %v137_v12 = vsel %vm136_vm4, 1.0, %v331_v11  ;;  %vm144_vm6 = vcmp.eq.s32.totalorder %v112_v3, 1  ;;  %vm153_vm7 = vcmp.eq.s32.totalorder %v112_v3, 0 }
  0x1d   : > { %v138_v13 = vsel %vm133_vm5, %v137_v12, 0.0 }
  0x22   : > { %v118_v5 = vld [vmem:[#allocation0] sm:$0xff] }
  0x23   : > { %v119_v6 = vsel %vm117_vm2, %v118_v5, 0.0  ;;  %v124_v7 = vsel %vm123_vm3, %v118_v5, 0.0 }
  0x24   : > { %120 = vadd.xlane.f32.xlu0 %v119_v6 }
  0xb1   : > { %v121_v8 = vpop.xlane.xlu0 %120 }
  0xb2   : > { %305 = vrcp.f32 %v121_v8  ;;  %vm160_vm8 = vweird.f32 %v121_v8 }
  0xbc   : > { %v306_v9 = vpop.eup %305 }
  0xbd   : > { %v126_v10 = vmul.f32 %v306_v9, %v124_v7 }
  0xbf   : > { %127 = vst [vmem:[#allocation4] sm:$0xff] %v126_v10 }
  0xc6   : > { %v140_v14 = vld [vmem:[#allocation4 + $0x1] ss:$0 sm:$0xff]  ;;  %v149_v17 = vld [vmem:[#allocation4] ss:$0 sm:$0xff] }
  0xc7   : > { %v141_v15 = vxor.u32 2147483648, %v140_v14  ;;  %v150_v19 = vxor.u32 2147483648, %v149_v17 }
  0xc9   : > { %v145_v16 = vmul.f32 %v141_v15, %v138_v13 }
  0xcb   : > { %146 = vadd.xlane.f32.xlu0 %v145_v16 }
 0x158   : > { %v147_v18 = vpop.xlane.xlu0 %146 }
 0x159   : > { %v148_v20 = vsel %vm144_vm6, %v147_v18, %v138_v13 }
 0x15a   : > { %v154_v21 = vmul.f32 %v150_v19, %v148_v20 }
 0x15c   : > { %155 = vadd.xlane.f32.xlu1 %v154_v21 }
 0x1e9   : > { %v156_v22 = vpop.xlane.xlu1 %155 }
 0x1ea   : > { %v157_v23 = vsel %vm153_vm7, %v156_v22, %v148_v20 }
 0x1eb   : > { %v159_v24 = vmul.f32 %v306_v9, %v157_v23 }
 0x1ed   : > { %v161_v25 = vsel %vm160_vm8, %v157_v23, %v159_v24 }
 0x1ee   : > { %162 = vst [vmem:[#allocation2] sm:$0xff] %v161_v25 }
 0x1f5   : > { %v166_v26 = vld [vmem:[#allocation2] sm:$0xf] }
 0x1f6   : > { %168 = vst [vmem:[%s106_s21] sm:$0xf] %v166_v26 }
 0x1fd   : > { %v193_v27 = vld [vmem:[%s106_s21] sm:$0xf] }
 0x1fe   : > { %194 = vst [vmem:[%s177_s25] sm:$0xf] %v193_v27 }
 0x1ff PF: > { %s7_s8 = sadd.s32 1, %s329_s8   ;;  %s391_s6 = smov %s325_s7 }
 0x200   : > { %p4_p5 = scmp.ge.s32.totalorder %s7_s8, 4   ;;  %s392_s7 = smov %s394_s10 }
 0x202   :  { %6 = sbr.rel (!%p4_p5) target bundleno = 2 (0x2), region = 111 }

// kernel: custom-call.17
= control target key start
LH: loop header
LB: loop body
LE: loop exit
PB: predicated region body
PF: predicated region fallthrough
CT: control target
= control target key end

     0   :  { %s343_s6 = smov 0   ;;  %s345_s7 = smov 0   ;;  %s390_s0 = inlined_call_operand.vmem [shape: f32[2,1,3,3], index: 0, kind: input, shape index: {}]   ;;  %s391_s1 = inlined_call_operand.vmem [shape: f32[2,1,3,3], index: 1, kind: output, shape index: {}]  }
   0x1   :  { %s347_s8 = smov 0  }
   0x2 LB: > { %s269_s9 = sadd.s32 4294967295, %s330_s8   ;;  %s33_s10 = sadd.s32 1, %s326_s7  ;;  %s330_s8 = sphi %s347_s8, %s7_s8   ;;  %s326_s7 = sphi %s345_s7, %s393_s7   ;;  %s322_s6 = sphi %s343_s6, %s392_s6  }
   0x3   : > { %p35_p0 = scmp.ge.s32.totalorder %s33_s10, 2  ;;  %p271_p1 = scmp.ge.s32.totalorder %s330_s8, 2 }
   0x4   : > { %s49_s11 = sand.u32 (!%p271_p1), 1, %s330_s8   ;;  %s273_s12 = sshll.u32 (!%p271_p1), %s326_s7, 2 }
   0x5   : > { %s395_s10 = smov (%p35_p0, %s33_s10), 0  ;;  %47 = sbr.rel (%p271_p1) target bundleno = 12 (0xc), region = 16 }
   0x6   : > { %s272_s13 = sshll.u32 (!%p271_p1), %s49_s11, 2  ;;  %s56_s16 = scalar_lea.vmem (!%p271_p1), %s390_s0, %s273_s12 }
   0x7   : > { %v72_v0 = vld [vmem:[%s56_s16] sm:$0xf] (!%p271_p1)  ;;  %s51_s17 = scalar_lea.vmem (!%p271_p1), [#allocation1], %s272_s13 }
   0x8   : > { %73 = vst [vmem:[%s51_s17] sm:$0xf] (!%p271_p1), %v72_v0 }
   0xc PF: > { %p274_p2 = scmp.ge.s32.totalorder %s330_s8, 1  ;;  %p89_p3 = scmp.lt.s32.totalorder %s330_s8, 3 }
   0xe   : > { %p90_p4 = pnand %p274_p2, %p89_p3 }
  0x10   : > { %93 = sbr.rel (%p90_p4) target bundleno = 511 (0x1ff), region = 50 }
  0x17   : > { %s370_s18 = sand.u32 1, %s269_s9   ;;  %v111_v1 = vlaneseq  ;;  %v332_v11 = vmov -1.0   ;;  %s278_s22 = sshll.u32 %s322_s6, 2 }
  0x18   : > { %s275_s19 = sshll.u32 %s370_s18, 2  ;;  %s178_s25 = scalar_lea.vmem %s391_s1, %s278_s22 }
  0x19   : > { %s102_s20 = scalar_lea.vmem [#allocation1], %s275_s19  ;;  %v112_v3 = vand.u32 127, %v111_v1  ;;  %v115_v4 = vshrl.u32 %v111_v1, 7  ;;  %s106_s21 = scalar_lea.vmem [#allocation3], %s275_s19 }
  0x1a   : > { %v109_v2 = vld [vmem:[%s102_s20] sm:$0xf] }
  0x1b   : > { %110 = vst [vmem:[#allocation0] sm:$0xf] %v109_v2  ;;  %vm113_vm0 = vcmp.lt.s32.totalorder %v112_v3, 3  ;;  %vm122_vm1 = vcmp.ge.s32.totalorder %v115_v4, %v112_v3  ;;  %vm117_vm2 = vcmp.eq.s32.totalorder %v115_v4, %v112_v3  ;;  %vm136_vm4 = vcmp.eq.s32.totalorder %v112_v3, 0 }
  0x1c   : > { %vm123_vm3 = vmand %vm122_vm1, %vm113_vm0  ;;  %vm133_vm5 = vcmp.eq.s32.totalorder %v112_v3, %v115_v4  ;;  %v137_v12 = vsel %vm136_vm4, 1.0, %v332_v11  ;;  %vm144_vm6 = vcmp.eq.s32.totalorder %v112_v3, 1  ;;  %vm154_vm7 = vcmp.eq.s32.totalorder %v112_v3, 2 }
  0x1d   : > { %v138_v13 = vsel %vm133_vm5, %v137_v12, 0.0 }
  0x22   : > { %v118_v5 = vld [vmem:[#allocation0] sm:$0xff] }
  0x23   : > { %v119_v6 = vsel %vm117_vm2, %v118_v5, 0.0  ;;  %v124_v7 = vsel %vm123_vm3, %v118_v5, 0.0 }
  0x24   : > { %120 = vadd.xlane.f32.xlu0 %v119_v6 }
  0xb1   : > { %v121_v8 = vpop.xlane.xlu0 %120 }
  0xb2   : > { %306 = vrcp.f32 %v121_v8  ;;  %vm161_vm8 = vweird.f32 %v121_v8 }
  0xbc   : > { %v307_v9 = vpop.eup %306 }
  0xbd   : > { %v126_v10 = vmul.f32 %v307_v9, %v124_v7 }
  0xbf   : > { %127 = vst [vmem:[#allocation4] sm:$0xff] %v126_v10 }
  0xc6   : > { %v140_v14 = vld [vmem:[#allocation4 + $0x1] ss:$0 sm:$0xff]  ;;  %v150_v17 = vld [vmem:[#allocation4 + $0x2] ss:$0 sm:$0xff] }
  0xc7   : > { %v141_v15 = vxor.u32 2147483648, %v140_v14  ;;  %v151_v19 = vxor.u32 2147483648, %v150_v17 }
  0xc9   : > { %v145_v16 = vmul.f32 %v141_v15, %v138_v13 }
  0xcb   : > { %146 = vadd.xlane.f32.xlu0 %v145_v16 }
 0x158   : > { %v147_v18 = vpop.xlane.xlu0 %146 }
 0x159   : > { %v148_v20 = vsel %vm144_vm6, %v147_v18, %v138_v13 }
 0x15a   : > { %v155_v21 = vmul.f32 %v151_v19, %v148_v20 }
 0x15c   : > { %156 = vadd.xlane.f32.xlu1 %v155_v21 }
 0x1e9   : > { %v157_v22 = vpop.xlane.xlu1 %156 }
 0x1ea   : > { %v158_v23 = vsel %vm154_vm7, %v157_v22, %v148_v20 }
 0x1eb   : > { %v160_v24 = vmul.f32 %v307_v9, %v158_v23 }
 0x1ed   : > { %v162_v25 = vsel %vm161_vm8, %v158_v23, %v160_v24 }
 0x1ee   : > { %163 = vst [vmem:[#allocation2] sm:$0xff] %v162_v25 }
 0x1f5   : > { %v167_v26 = vld [vmem:[#allocation2] sm:$0xf] }
 0x1f6   : > { %169 = vst [vmem:[%s106_s21] sm:$0xf] %v167_v26 }
 0x1fd   : > { %v194_v27 = vld [vmem:[%s106_s21] sm:$0xf] }
 0x1fe   : > { %195 = vst [vmem:[%s178_s25] sm:$0xf] %v194_v27 }
 0x1ff PF: > { %s7_s8 = sadd.s32 1, %s330_s8   ;;  %s392_s6 = smov %s326_s7 }
 0x200   : > { %p4_p5 = scmp.ge.s32.totalorder %s7_s8, 4   ;;  %s393_s7 = smov %s395_s10 }
 0x202   :  { %6 = sbr.rel (!%p4_p5) target bundleno = 2 (0x2), region = 112 }

// kernel: unsup_loss.1
= control target key start
LH: loop header
LB: loop body
LE: loop exit
PB: predicated region body
PF: predicated region fallthrough
CT: control target
= control target key end

     0   :  { %s1523_s0 = inlined_call_operand.vmem [shape: f32[96], index: 0, kind: input, shape index: {}]   ;;  %s1524_s1 = inlined_call_operand.vmem [shape: f32[1,256], index: 1, kind: input, shape index: {}]   ;;  %s1525_s2 = inlined_call_operand.vmem [shape: f32[1,256], index: 2, kind: input, shape index: {}]   ;;  %s1526_s3 = inlined_call_operand.vmem [shape: f32[2,1,256], index: 3, kind: input, shape index: {}]   ;;  %s1527_s4 = inlined_call_operand.vmem [shape: bf16[2,3,48,16], index: 4, kind: input, shape index: {}]   ;;  %s1528_s5 = inlined_call_operand.vmem [shape: f32[2,3,3,256], index: 5, kind: output, shape index: {0}]   ;;  %s1529_s6 = inlined_call_operand.vmem [shape: f32[2,3,1,256], index: 6, kind: output, shape index: {1}]  }
   0x1   :  { %1530 = sst [smem:[#allocation7_spill]] %s1523_s0 }
   0x2   :  { %12 = vsyncpa [#allocation3], 0  ;;  %s1273_s21 = smov 0   ;;  %s1275_s22 = smov 0  }
   0x3   :  { %s1277_s23 = smov 0   ;;  %s1279_s24 = smov 0  }
   0x4   :  { %s1281_s25 = smov 0  }
   0x5 LB: > { %s1081_s26 = sadd.s32 4294967295, %s1232_s25   ;;  %s33_s27 = sadd.s32 1, %s1224_s23  ;;  %s1232_s25 = sphi %s1281_s25, %s18_s25   ;;  %s1228_s24 = sphi %s1279_s24, %s1545_s24   ;;  %s1224_s23 = sphi %s1277_s23, %s1544_s23   ;;  %s1220_s22 = sphi %s1275_s22, %s1543_s22   ;;  %s1216_s21 = sphi %s1273_s21, %s1542_s21  }
   0x6   : > { %p35_p0 = scmp.ge.s32.totalorder %s33_s27, 3  ;;  %s37_s28 = sadd.s32 1, %s1228_s24 }
   0x7   : > { %p1083_p1 = scmp.ge.s32.totalorder %s1232_s25, 1  ;;  %p231_p2 = scmp.lt.s32.totalorder %s1232_s25, 7 }
   0x8   : > { %s1547_s27 = smov (%p35_p0, %s33_s27), 0  ;;  %s1549_s28 = smov (!%p35_p0, %s37_s28), %s1228_s24 }
   0x9   : > { %1531 = sst [smem:[#allocation5_spill]] %s1547_s27  ;;  %p1306_p3 = pnand %p1083_p1, %p231_p2 }
   0xa   : > { %p39_p4 = scmp.ge.s32.totalorder %s1549_s28, 2  ;;  %p1310_p5 = scmp.eq.s32.totalorder %s1081_s26, 0 }
   0xb   : > { %p1120_p6 = pneg %p1306_p3  ;;  %s1534_s0 = sld [smem:[#allocation7_spill]] }
   0xc   : > { %s1551_s28 = smov (%p39_p4, %s1549_s28), 0 }
   0xd   : > { %1535 = sst [smem:[#allocation6_spill]] %s1551_s28  ;;  %p1121_p7 = pnand %p1310_p5, %p1120_p6 }
   0xf   : > { %p1177_p9 = pneg %p1121_p7 }
  0x11   : > { %s244_s9 = sshll.u32 %s1534_s0, 4  ;;  %s245_s9 = int_to_ptr.vmem [resolvable:$true] %s244_s9 }
  0x12   : > { %s1175_s10 = scalar_lea.vmem %s245_s9, 16  ;;  %p1183_p12 = scmp.lt.s32.totalorder %s245_s9, %s245_s9 }
  0x13   : > { %p1176_p8 = scmp.ne.s32.totalorder %s245_s9, %s1175_s10  ;;  %p1184_p13 = scmp.lt.s32.totalorder %s1175_s10, %s1175_s10 }
  0x15   : > { %p1178_p10 = pnand %p1177_p9, %p1176_p8  ;;  %p1185_p0 = por %p1184_p13, %p1183_p12 }
  0x17   : > { %p1179_p11 = pneg %p1178_p10 }
  0x19   : > { %p1186_p1 = pnand %p1185_p0, %p1179_p11 }
  0x1b   : > { %1189 = shalt.err (!%p1186_p1)
}
  0x1c   : > { %s1234_s11 = smov [#allocation2]   ;;  %297 = sbr.rel (%p1306_p3) target bundleno = 353 (0x161), region = 40 }
  0x1d   : > { %1123 = dma.vmem_to_smem (!%p1121_p7), %s245_s9, 16, %s1234_s11, [#allocation3]  }
  0x23   : > { %1211 = dma.done.wait (%p1310_p5), [#allocation3], 16  }
  0x24   : > { %1213 = vsyncadd (%p1310_p5), [#allocation3], 4294967280 }
  0x25   : > { %303 = sfence }
  0x26   : > { %p379_p2 = scmp.lt.s32.totalorder %s1220_s22, 1  ;;  %s424_s12 = smul.u32 3, %s1220_s22  ;;  %v1235_v0 = vmov 0   ;;  %v427_v1 = vld [vmem:[%s1524_s1] sm:$0x3]  ;;  %v525_v36 = vlaneseq }
  0x27   : > { %709 = vmatprep.mubr.bf16.mxu0 %v1235_v0  ;;  %719 = vmatprep.mubr.bf16.mxu1 %v1235_v0  ;;  %p389_p3 = scmp.lt.s32.totalorder %s1216_s21, 2  ;;  %v428_v2 = vld [vmem:[%s1525_s2] sm:$0x3] }
  0x28   : > { %s1553_s22 = smov (!%p379_p2, %s1220_s22), 1  ;;  %s425_s13 = sadd.s32 %s1216_s21, %s424_s12  ;;  %v1387_v41 = vshrl.u32 %v525_v36, 7 }
  0x29   : > { %s1090_s14 = sshll.u32 %s1553_s22, 1  ;;  %s1339_s15 = sshll.u32 %s425_s13, 4 }
  0x2a   : > { %s1342_s16 = sld [smem:[#allocation2 + %s1339_s15]]  ;;  %s431_s17 = sadd.s32 1, %s1339_s15  ;;  %v1392_v46 = vsub.s32 1, %v1387_v41  ;;  %v1395_v47 = vsub.s32 0, %v1387_v41  ;;  %v1399_v51 = vadd.s32 8, %v1387_v41 }
  0x2b   : > { %s1345_s18 = sld [smem:[#allocation2 + %s431_s17]]  ;;  %s433_s19 = sadd.s32 2, %s1339_s15 }
  0x2c   : > { %s441_s20 = sadd.s32 6, %s1339_s15  ;;  %s443_s26 = sadd.s32 7, %s1339_s15 }
  0x2d   : > { %s442_s29 = sld [smem:[#allocation2 + %s441_s20]]  ;;  %s385_s9 = scalar_lea.vmem %s1526_s3, %s1090_s14 }
  0x2e   : > { %s444_s30 = sld [smem:[#allocation2 + %s443_s26]]  ;;  %s445_s10 = sadd.s32 8, %s1339_s15  ;;  %v429_v11 = vld [vmem:[%s385_s9] sm:$0x3] }
  0x2f   : > { %s1354_s11 = sld [smem:[#allocation2 + %s433_s19]]  ;;  %s451_s13 = sadd.s32 11, %s1339_s15 }
  0x30   : > { %s446_s12 = sld [smem:[#allocation2 + %s445_s10]]  ;;  %s1110_s17 = smul.u32 18, %s1553_s22  ;;  %v453_v5 = vstv %s1342_s16 }
  0x31   : > { %s1364_s26 = sld [smem:[#allocation2 + %s451_s13]]  ;;  %s435_s14 = sadd.s32 3, %s1339_s15  ;;  %v455_v6 = vstv %s1345_s18  ;;  %v454_v12 = vmul.f32 %v453_v5, %v427_v1 }
  0x32   : > { %s1555_s21 = smov (!%p389_p3, %s1216_s21), 2  ;;  %s436_s19 = sld [smem:[#allocation2 + %s435_s14]]  ;;  %v456_v13 = vmul.f32 %v455_v6, %v428_v2 }
  0x33   : > { %v473_v3 = vstv %s442_s29  ;;  %s437_s7 = sadd.s32 4, %s1339_s15  ;;  %s1109_s0 = smul.u32 6, %s1555_s21 }
  0x34   : > { %v475_v4 = vstv %s444_s30  ;;  %v474_v7 = vmul.f32 %v473_v3, %v427_v1  ;;  %s438_s27 = sld [smem:[#allocation2 + %s437_s7]]  ;;  %s439_s28 = sadd.s32 5, %s1339_s15  ;;  %v457_v20 = vadd.f32 %v456_v13, %v454_v12 }
  0x35   : > { %v476_v8 = vmul.f32 %v475_v4, %v428_v2  ;;  %s449_s8 = sadd.s32 10, %s1339_s15  ;;  %s393_s10 = sadd.s32 %s1110_s17, %s1109_s0  ;;  %v458_v22 = vstv %s1354_s11 }
  0x36   : > { %v478_v9 = vstv %s446_s12  ;;  %s440_s13 = sld [smem:[#allocation2 + %s439_s28]]  ;;  %s1091_s29 = sshll.u32 %s393_s10, 2  ;;  %v459_v27 = vadd.f32 %v458_v22, %v457_v20 }
  0x37   : > { %v477_v10 = vadd.f32 %v476_v8, %v474_v7  ;;  %s1381_s30 = scalar_lea.vmem %s1527_s4, %s1091_s29  ;;  %s450_s20 = sld [smem:[#allocation2 + %s449_s8]]  ;;  %v481_v15 = vstv %s1364_s26 }
  0x38   : > { %s447_s14 = sadd.s32 9, %s1339_s15  ;;  %v463_v16 = vstv %s436_s19  ;;  %v460_v31 = vmul.f32 %v459_v27, %v429_v11  ;;  %s1111_s15 = smul.u32 6, %s1553_s22 }
  0x39   : > { %v479_v14 = vadd.f32 %v478_v9, %v477_v10  ;;  %v464_v18 = vmul.f32 %v463_v16, %v427_v1  ;;  %s448_s9 = sld [smem:[#allocation2 + %s447_s14]]  ;;  %s1092_s11 = sshll.u32 %s1555_s21, 1 }
  0x3a   : > { %v465_v19 = vstv %s438_s27  ;;  %s1468_s12 = sadd.s32 %s1111_s15, %s1092_s11 }
  0x3b   : > { %v480_v17 = vmul.f32 %v479_v14, %v429_v11  ;;  %v466_v21 = vmul.f32 %v465_v19, %v428_v2  ;;  %s421_s19 = scalar_lea.vmem %s1529_s6, %s1468_s12  ;;  %s1093_s21 = sshll.u32 %s1468_s12, 2 }
  0x3c   : > { %v468_v24 = vstv %s440_s13  ;;  %s408_s0 = scalar_lea.vmem %s1528_s5, %s1093_s21 }
  0x3d   : > { %v482_v23 = vadd.f32 %v481_v15, %v480_v17  ;;  %v467_v25 = vadd.f32 %v466_v21, %v464_v18  ;;  %v471_v29 = vstv %s450_s20 }
  0x3f   : > { %v483_v26 = vadd.f32 1e-10, %v482_v23  ;;  %v469_v28 = vadd.f32 %v468_v24, %v467_v25  ;;  %v461_v33 = vstv %s448_s9 }
  0x40   : > { %v462_v34 = vadd.f32 %v461_v33, %v460_v31  ;;  %v1170_v31 = vld [vmem:[%s1381_s30] sm:$0xff]  }
  0x41   : > { %1173 = vrcp.f32 %v483_v26  ;;  %v470_v30 = vmul.f32 %v469_v28, %v429_v11 }
  0x43   : > { %v472_v32 = vadd.f32 %v471_v29, %v470_v30 }
  0x4b   : > { %v1174_v35 = vpop.eup %1173 }
  0x4c   : > { %v486_v37 = vmul.f32 %v1174_v35, %v462_v34  ;;  %v487_v38 = vmul.f32 %v1174_v35, %v472_v32  ;;  %v1171_v32 = vld [vmem:[%s1381_s30 + $0x8] sm:$0xff]   ;;  %v1172_v34 = vld [vmem:[%s1381_s30 + $0x10] sm:$0xff]  }
  0x4e   : > { %v488_v39 = vfloor.f32 %v486_v37  ;;  %v491_v40 = vfloor.f32 %v487_v38 }
  0x50   : > { %v1112_v42 = vtrunc.f32 %v488_v39  ;;  %v1114_v43 = vtrunc.f32 %v491_v40 }
  0x52   : > { %v1113_v44 = vcvt.f32.s32 %v1112_v42  ;;  %v1389_v45 = vcvt.f32.s32 %v1114_v43 }
  0x54   : > { %v490_v48 = vadd.s32 1, %v1113_v44  ;;  %vm494_vm0 = vcmp.ge.s32.totalorder %v1113_v44, 0  ;;  %vm503_vm1 = vcmp.gt.s32.totalorder %v1113_v44, 0  ;;  %v493_v49 = vadd.s32 1, %v1389_v45 }
  0x55   : > { %v504_v50 = vsel %vm503_vm1, %v1113_v44, 0  ;;  %vm511_vm2 = vcmp.gt.s32.totalorder %v1389_v45, 0 }
  0x56   : > { %vm495_vm3 = vcmp.le.s32.totalorder %v490_v48, 15  ;;  %vm505_vm4 = vcmp.lt.s32.totalorder %v504_v50, 15  ;;  %vm507_vm5 = vcmp.gt.s32.totalorder %v490_v48, 0  ;;  %v512_v52 = vsel %vm511_vm2, %v1389_v45, 0 }
  0x57   : > { %vm1403_vm6 = vmand %vm494_vm0, %vm495_vm3  ;;  %v506_v54 = vsel %vm505_vm4, %v504_v50, 15  ;;  %v508_v55 = vsel %vm507_vm5, %v490_v48, 0  ;;  %vm513_vm7 = vcmp.lt.s32.totalorder %v512_v52, 15  ;;  %vm515_vm8 = vcmp.gt.s32.totalorder %v493_v49, 0 }
  0x58   : > { %vm509_vm9 = vcmp.lt.s32.totalorder %v508_v55, 15  ;;  %v535_v56 = vrot.slane %v506_v54, %v1392_v46  ;;  %v531_v57 = vrot.slane %v506_v54, %v1395_v47  ;;  %v1409_v58 = vsel %vm513_vm7, %v512_v52, 15 }
  0x59   : > { %v510_v59 = vsel %vm509_vm9, %v508_v55, 15  ;;  %v516_v60 = vsel %vm515_vm8, %v493_v49, 0  ;;  %v591_v1 = vrot.slane %v1409_v58, %v1395_v47  ;;  %vm667_vm5 = vcmask 130048  }
  0x5a   : > { %v519_v61 = vcvt.s32.f32 %v510_v59  ;;  %v562_v62 = vrot.slane %v510_v59, %v1392_v46  ;;  %vm537_vm10 = vcmp.eq.s32.totalorder %v1387_v41, %v535_v56  ;;  %v558_v63 = vrot.slane %v510_v59, %v1395_v47 }
  0x5b   : > { %vm517_vm11 = vcmp.lt.s32.totalorder %v516_v60, 15  ;;  %vm539_vm12 = vcmp.eq.s32.totalorder %v1399_v51, %v535_v56  ;;  %vm536_vm13 = vcmp.eq.s32.totalorder %v1387_v41, %v531_v57  ;;  %vm538_vm0 = vcmp.eq.s32.totalorder %v1399_v51, %v531_v57 }
  0x5c   : > { %v520_v2 = vsub.f32 %v519_v61, %v486_v37  ;;  %v1418_v3 = vsel %vm517_vm11, %v516_v60, 15  ;;  %vm564_vm14 = vcmp.eq.s32.totalorder %v1387_v41, %v562_v62  ;;  %vm566_vm15 = vcmp.eq.s32.totalorder %v1399_v51, %v562_v62 }
  0x5d   : > { %v522_v4 = vcvt.s32.f32 %v1418_v3  ;;  %v618_v8 = vrot.slane %v1418_v3, %v1395_v47  ;;  %vm563_vm1 = vcmp.eq.s32.totalorder %v1387_v41, %v558_v63  ;;  %vm565_vm2 = vcmp.eq.s32.totalorder %v1399_v51, %v558_v63 }
  0x5e   : > { %v521_v5 = vsub.f32 1.0, %v520_v2  ;;  %v548_v6 = vrot.slane %v520_v2, %v1392_v46  ;;  %v544_v7 = vrot.slane %v520_v2, %v1395_v47  ;;  %vm596_vm3 = vcmp.eq.s32.totalorder %v1387_v41, %v591_v1 }
  0x5f   : > { %v523_v9 = vsub.f32 %v522_v4, %v487_v38  ;;  %vm623_vm4 = vcmp.eq.s32.totalorder %v1387_v41, %v618_v8  ;;  %vm598_vm7 = vcmp.eq.s32.totalorder %v1399_v51, %v591_v1  ;;  %vm625_vm8 = vcmp.eq.s32.totalorder %v1399_v51, %v618_v8 }
  0x60   : > { %v552_v10 = vsel %vm537_vm10, %v548_v6, 0.0  ;;  %v554_v11 = vsel %vm539_vm12, %v548_v6, 0.0  ;;  %v575_v12 = vrot.slane %v521_v5, %v1392_v46  ;;  %v551_v13 = vsel %vm536_vm13, %v544_v7, 0.0 }
  0x61   : > { %v553_v14 = vsel %vm538_vm0, %v544_v7, 0.0  ;;  %v571_v15 = vrot.slane %v521_v5, %v1395_v47  ;;  %v524_v16 = vsub.f32 1.0, %v523_v9  ;;  %v604_v17 = vrot.slane %v523_v9, %v1395_v47 }
  0x62   : > { %v579_v18 = vsel %vm564_vm14, %v575_v12, 0.0  ;;  %v581_v19 = vsel %vm566_vm15, %v575_v12, 0.0  ;;  %vm497_vm9 = vcmp.ge.s32.totalorder %v1389_v45, 0  ;;  %vm499_vm11 = vcmp.le.s32.totalorder %v1389_v45, 15 }
  0x63   : > { %v583_v20 = vadd.f32 %v579_v18, %v552_v10  ;;  %v585_v21 = vadd.f32 %v581_v19, %v554_v11  ;;  %v578_v22 = vsel %vm563_vm1, %v571_v15, 0.0  ;;  %v580_v23 = vsel %vm565_vm2, %v571_v15, 0.0  ;;  %vm498_vm10 = vmand %vm1403_vm6, %vm497_vm9 }
  0x64   : > { %v582_v24 = vadd.f32 %v578_v22, %v551_v13  ;;  %v584_v25 = vadd.f32 %v580_v23, %v553_v14  ;;  %v611_v26 = vsel %vm596_vm3, %v604_v17, 0.0  ;;  %v631_v27 = vrot.slane %v524_v16, %v1395_v47  ;;  %vm500_vm12 = vmand %vm498_vm10, %vm499_vm11 }
  0x65   : > { %v587_v28 = vpack.c.bf16 %v585_v21, %v583_v20  ;;  %v613_v35 = vsel %vm598_vm7, %v604_v17, 0.0  ;;  %vm1475_vm13 = vcmp.lt.s32.totalorder %v525_v36, 256  ;;  %v595_v42 = vrot.slane %v1409_v58, %v1392_v46 }
  0x66   : > { %v586_v29 = vpack.c.bf16 %v584_v25, %v582_v24  ;;  %v638_v30 = vsel %vm623_vm4, %v631_v27, 0.0  ;;  %v640_v37 = vsel %vm625_vm8, %v631_v27, 0.0  ;;  %v622_v43 = vrot.slane %v1418_v3, %v1392_v46 }
  0x67   : > { %677 = vmatprep.subr.bf16.mxu0 %v587_v28  ;;  %1107 = vmatprep.subr.bf16.mxu1 %v587_v28  ;;  %v1454_v33 = vadd.f32 %v638_v30, %v611_v26  ;;  %v1460_v38 = vadd.f32 %v640_v37, %v613_v35  ;;  %v608_v44 = vrot.slane %v523_v9, %v1392_v46  ;;  %v1237_v18 = vmov 1966171168  }
  0x68   : > { %678 = vmatpush1.bf16.msra.mxu0 %v586_v29  ;;  %1108 = vmatpush1.bf16.msra.mxu1 %v586_v29  ;;  %v635_v45 = vrot.slane %v524_v16, %v1392_v46  ;;  %vm597_vm6 = vcmp.eq.s32.totalorder %v1387_v41, %v595_v42  ;;  %vm624_vm14 = vcmp.eq.s32.totalorder %v1387_v41, %v622_v43  ;;  %v762_v19 = vunpack.c.l.s4 %v1237_v18 }
  0x69   : > { %vm599_vm15 = vcmp.eq.s32.totalorder %v1399_v51, %v595_v42  ;;  %vm626_vm0 = vcmp.eq.s32.totalorder %v1399_v51, %v622_v43  ;;  %v612_v36 = vsel %vm597_vm6, %v608_v44, 0.0 }
  0x6a   : > { %v639_v47 = vsel %vm624_vm14, %v635_v45, 0.0  ;;  %v614_v48 = vsel %vm599_vm15, %v608_v44, 0.0  ;;  %v641_v49 = vsel %vm626_vm0, %v635_v45, 0.0 }
  0x6b   : > { %1100 = vmatmul.mubr.msk.bf16.vlgmr.msra.gmra.mrb[0].mxu0 %vm667_vm5, %v1170_v31  ;;  %1101 = vmatmul.mubr.msk.bf16.vlgmr.msra.gmra.mrb[0].mxu1 %vm667_vm5, %v1171_v32  ;;  %v643_v50 = vadd.f32 %v639_v47, %v612_v36  ;;  %v645_v54 = vadd.f32 %v641_v49, %v614_v48 }
  0x6c   : > { %729 = vmatprep.mubr.bf16.mxu1 %v1235_v0  ;;  %v1236_v0 = vmov 0.0  }
  0x6d   : > { %v1096_v39 = vsel %vm500_vm12, 1.0, %v1236_v0 }
  0x6e   : > { %857 = vst.msk [vmem:[%s421_s19] sm:$0x3] %vm1475_vm13, %v1096_v39 }
  0x73   : > { %1102 = vmatmul.mubr.msk.bf16.gmra.mrb[4].mxu1 %vm667_vm5, %v1172_v34 }
 0x13e   : > { %v711_v52 = vpop.f32.mrb[0].mxu0  ;;  %v721_v53 = vpop.f32.mrb[0].mxu1 }
 0x13f   : > { %v740_v55 = vmul.f32 %v711_v52, %v1454_v33  ;;  %v781_v46 = vmul.f32 %v721_v53, %v1454_v33  ;;  %v713_v56 = vpop.f32.mrb[1].mxu0  ;;  %v723_v57 = vpop.f32.mrb[1].mxu1 }
 0x140   : > { %v741_v58 = vmul.f32 %v713_v56, %v643_v50  ;;  %v782_v59 = vmul.f32 %v723_v57, %v643_v50  ;;  %v715_v60 = vpop.f32.mrb[2].mxu0  ;;  %v725_v61 = vpop.f32.mrb[2].mxu1 }
 0x141   : > { %v742_v51 = vmul.f32 %v715_v60, %v1460_v38  ;;  %v783_v62 = vmul.f32 %v725_v61, %v1460_v38  ;;  %v717_v63 = vpop.f32.mrb[3].mxu0  ;;  %v727_v1 = vpop.f32.mrb[3].mxu1 }
 0x142   : > { %v743_v2 = vmul.f32 %v717_v63, %v645_v54  ;;  %v784_v3 = vmul.f32 %v727_v1, %v645_v54 }
 0x143   : > { %v744_v4 = vadd.f32 %v742_v51, %v740_v55  ;;  %v785_v5 = vadd.f32 %v783_v62, %v781_v46 }
 0x144   : > { %v751_v6 = vadd.f32 %v743_v2, %v741_v58  ;;  %v792_v7 = vadd.f32 %v784_v3, %v782_v59 }
 0x145   : > { %v745_v8 = vrot.slane %v744_v4, 4  ;;  %v786_v9 = vrot.slane %v785_v5, 4 }
 0x146   : > { %v752_v10 = vrot.slane %v751_v6, 4  ;;  %v793_v11 = vrot.slane %v792_v7, 4  ;;  %v731_v12 = vpop.f32.mrb[4].mxu1 }
 0x147   : > { %v746_v13 = vadd.f32 %v745_v8, %v744_v4  ;;  %v787_v14 = vadd.f32 %v786_v9, %v785_v5  ;;  %v819_v15 = vmul.f32 %v731_v12, %v1454_v33  ;;  %v733_v16 = vpop.f32.mrb[5].mxu1  ;;  %v763_v33 = vunpack.c.0.s8 %v762_v19 }
 0x148   : > { %v753_v17 = vadd.f32 %v752_v10, %v751_v6  ;;  %v794_v20 = vadd.f32 %v793_v11, %v792_v7  ;;  %v820_v21 = vmul.f32 %v733_v16, %v643_v50  ;;  %v735_v22 = vpop.f32.mrb[6].mxu1 }
 0x149   : > { %v747_v23 = vrot.slane %v746_v13, 2  ;;  %v788_v24 = vrot.slane %v787_v14, 2  ;;  %v821_v25 = vmul.f32 %v735_v22, %v1460_v38  ;;  %v737_v26 = vpop.f32.mrb[7].mxu1  ;;  %v766_v49 = vsub.s32 %v763_v33, %v1387_v41 }
 0x14a   : > { %v754_v27 = vrot.slane %v753_v17, 2  ;;  %v795_v28 = vrot.slane %v794_v20, 2  ;;  %v822_v29 = vmul.f32 %v737_v26, %v645_v54 }
 0x14b   : > { %v748_v30 = vadd.f32 %v747_v23, %v746_v13  ;;  %v789_v31 = vadd.f32 %v788_v24, %v787_v14  ;;  %v823_v32 = vadd.f32 %v821_v25, %v819_v15 }
 0x14c   : > { %v755_v34 = vadd.f32 %v754_v27, %v753_v17  ;;  %v796_v35 = vadd.f32 %v795_v28, %v794_v20  ;;  %v830_v37 = vadd.f32 %v822_v29, %v820_v21 }
 0x14d   : > { %v749_v0 = vrot.slane %v748_v30, 1  ;;  %v790_v39 = vrot.slane %v789_v31, 1  ;;  %v824_v42 = vrot.slane %v823_v32, 4 }
 0x14e   : > { %v756_v43 = vrot.slane %v755_v34, 1  ;;  %v797_v44 = vrot.slane %v796_v35, 1  ;;  %v831_v45 = vrot.slane %v830_v37, 4 }
 0x14f   : > { %v750_v36 = vadd.f32 %v749_v0, %v748_v30  ;;  %v791_v38 = vadd.f32 %v790_v39, %v789_v31  ;;  %v825_v47 = vadd.f32 %v824_v42, %v823_v32 }
 0x150   : > { %v757_v48 = vadd.f32 %v756_v43, %v755_v34  ;;  %v798_v50 = vadd.f32 %v797_v44, %v796_v35  ;;  %v832_v52 = vadd.f32 %v831_v45, %v830_v37 }
 0x151   : > { %v826_v53 = vrot.slane %v825_v47, 2 }
 0x152   : > { %v760_v54 = vcombine.low %v750_v36, %v757_v48  ;;  %v801_v55 = vcombine.low %v791_v38, %v798_v50  ;;  %v833_v46 = vrot.slane %v832_v52, 2 }
 0x153   : > { %v827_v56 = vadd.f32 %v826_v53, %v825_v47 }
 0x154   : > { %v767_v57 = vrot.slane %v760_v54, %v766_v49  ;;  %v808_v58 = vrot.slane %v801_v55, %v766_v49  ;;  %v834_v59 = vadd.f32 %v833_v46, %v832_v52 }
 0x155   : > { %v828_v60 = vrot.slane %v827_v56, 1 }
 0x156   : > { %v774_v61 = vrot.slane %v767_v57, %v766_v49  ;;  %v815_v51 = vrot.slane %v808_v58, %v766_v49  ;;  %v835_v62 = vrot.slane %v834_v59, 1 }
 0x157   : > { %v829_v41 = vadd.f32 %v828_v60, %v827_v56 }
 0x158   : > { %780 = vst.msk [vmem:[%s408_s0] ss:$4 sm:$0x3] %vm1475_vm13, %v774_v61  ;;  %1103 = vst.msk [vmem:[%s408_s0 + $0x1] ss:$4 sm:$0x3] %vm1475_vm13, %v815_v51  ;;  %v836_v63 = vadd.f32 %v835_v62, %v834_v59 }
 0x15a   : > { %v839_v1 = vcombine.low %v829_v41, %v836_v63 }
 0x15c   : > { %v846_v2 = vrot.slane %v839_v1, %v766_v49 }
 0x15e   : > { %v853_v3 = vrot.slane %v846_v2, %v766_v49 }
 0x160   : > { %1104 = vst.msk [vmem:[%s408_s0 + $0x2] ss:$4 sm:$0x3] %vm1475_vm13, %v853_v3 }
 0x161 PF: > { %s18_s25 = sadd.s32 1, %s1232_s25   ;;  %s1540_s27 = sld [smem:[#allocation5_spill]] }
 0x162   : > { %p15_p4 = scmp.ge.s32.totalorder %s18_s25, 8   ;;  %s1541_s28 = sld [smem:[#allocation6_spill]] }
 0x163   : > { %s1542_s21 = smov %s1224_s23  ;;  %s1543_s22 = smov %s1228_s24 }
 0x164   :  { %17 = sbr.rel (!%p15_p4) target bundleno = 5 (0x5), region = 98 }
 0x167   : > { %s1544_s23 = smov %s1540_s27 }
 0x168   : > { %s1545_s24 = smov %s1541_s28 }
 0x16b   :  { %927 = vsyncpa [#allocation3], 1 }
 0x16c   :  { %929 = vsyncpa [#allocation3 + $0x1], 1 }

</bundles_post_ra>
